<compile_context>
chip_gen: v6e
topology: v6e:2x2x1
jax: 0.10.0
libtpu: 0.0.40
codegen_flags: <defaults>
</compile_context>

<pallas_src>
import functools

import jax
import jax.numpy as jnp
from jax import lax
from jax.experimental import pallas as pl
from jax.experimental.pallas import tpu as pltpu

# ----------------------------------------------------------------------------
# "Module parameters" (deterministic, in-script; default unit factors == 1.0)
# ----------------------------------------------------------------------------
CUTOFF = 8.0                 # long-range cutoff
CUTOFF_SHORT = 4.0           # short-range cutoff (!= CUTOFF -> split_distance)
KEHALF = 7.199822675975274   # kehalf_ase * q^2 / E / r with unit factors 1.0
CUTOFF_SQ = CUTOFF * CUTOFF
SPLIT_DISTANCE = (CUTOFF_SHORT != CUTOFF)

LANE = 128            # TPU lane width
SUB = 8               # sublane rows per aligned vreg load
ROWS_PER_DOT = 2      # K = ROWS_PER_DOT * LANE = 256 contraction per MXU dot
N_PAD = 128           # atoms padded to one lane-dense row (toy kernel: N <= 128)
N_CHUNKS = 2          # leading "parallel" pair-chunk axis -> 2 TCs on v7x
MAX_BLOCK_ROWS = 128  # up to 128*128 = 16384 pairs per grid step


def _poly6_switch(d, rc):
    # Poly6 (PhysNet-style) switch-off: 1 - 6x^5 + 15x^4 - 10x^3 for x = d/rc < 1
    x = d * (1.0 / rc)
    x3 = x * x * x
    poly = 1.0 - x3 * (6.0 * x * x - 15.0 * x + 10.0)
    return jnp.where(x < 1.0, poly, jnp.zeros_like(x))


def _pair_energy(d):
    """f(d): per-pair kernel WITHOUT charges / kehalf, masked beyond the cutoff."""
    r = pl.reciprocal(d, approx=True)        # EUP slot
    inv_d = r * (2.0 - d * r)                # one Newton step -> ~1 ulp, holds 1e-5
    x2 = d * d + 1.0
    inv_dsh = lax.rsqrt(x2)                  # EUP rsqrt replaces sqrt + divide
    if SPLIT_DISTANCE:
        d_sh = x2 * inv_dsh                  # sqrt(x) = x * rsqrt(x)
        e_ord = inv_d + d * (1.0 / CUTOFF_SQ) - (2.0 / CUTOFF)
        e_shd = inv_dsh + d_sh * (1.0 / CUTOFF_SQ) - (2.0 / CUTOFF)
    else:
        e_ord = inv_d
        e_shd = inv_dsh
    sw_off = _poly6_switch(d, CUTOFF_SHORT)
    e = e_ord + sw_off * (e_shd - e_ord)     # == sw*e_shd + (1-sw)*e_ord
    return jnp.where(d <= CUTOFF, e, jnp.zeros_like(e))


# ----------------------------------------------------------------------------
# Pallas kernel
# ----------------------------------------------------------------------------
def _pc_kernel(d_ref, idx_i_ref, idx_j_ref, q_ref, out_ref, *, num_steps, unroll):
    # d_ref/idx_i_ref/idx_j_ref : (block_rows, 128)  pair tile, sublane-dense
    # q_ref                     : (1, N_PAD)         lane-dense charge row
    # out_ref                   : (1, N_PAD)         per-chunk partial sums (f32)
    p = pl.program_id(1)          # pair-block axis ("arbitrary" reduction)

    @pl.when(p == 0)
    def _init():
        out_ref[...] = jnp.zeros_like(out_ref)

    q = q_ref[...]                                                # (1, N_PAD)
    # Shared atom-id grid for both one-hots (j-gather and i-scatter), hoisted
    # out of the loop (JAX does not CSE broadcast_in_dim).
    ids = lax.broadcasted_iota(jnp.int32, (N_PAD, ROWS_PER_DOT * LANE), 0)

    def row_group(it, acc):
        base = pl.multiple_of(it * SUB, SUB)                      # aligned vreg loads
        d8 = d_ref[pl.ds(base, SUB), :]                           # (8, 128)
        ii8 = idx_i_ref[pl.ds(base, SUB), :]
        jj8 = idx_j_ref[pl.ds(base, SUB), :]
        for s in range(0, SUB, ROWS_PER_DOT):                     # static: 4 row-pairs
            # Lane-concat two 128-pair rows -> K = 256 (v6e/v7x MXU depth).
            d_c = jnp.concatenate([d8[s:s + 1, :], d8[s + 1:s + 2, :]], axis=1)
            ii_c = jnp.concatenate([ii8[s:s + 1, :], ii8[s + 1:s + 2, :]], axis=1)
            jj_c = jnp.concatenate([jj8[s:s + 1, :], jj8[s + 1:s + 2, :]], axis=1)
            e_c = _pair_energy(d_c)                               # (1, 256), masked
            # Gather q_j via one-hot matmul (exact 0/1 f32 weights).
            oh_j = (jj_c == ids).astype(jnp.float32)              # (N_PAD, 256)
            q_j = jnp.dot(q, oh_j, preferred_element_type=jnp.float32)   # (1, 256)
            we = q_j * e_c                                        # (1, 256)
            # Scatter over idx_i: contract the 256 pair lanes with the one-hot.
            oh_i = (ii_c == ids).astype(jnp.float32)              # (N_PAD, 256)
            acc = acc + lax.dot_general(
                we, oh_i, dimension_numbers=(((1,), (1,)), ((), ())),
                preferred_element_type=jnp.float32)               # (1, N_PAD)
        return acc

    acc = lax.fori_loop(0, num_steps, row_group,
                        jnp.zeros((1, N_PAD), jnp.float32), unroll=unroll)
    out_ref[...] += acc


# ----------------------------------------------------------------------------
# pallas_call builder + wrapper
# ----------------------------------------------------------------------------
@functools.lru_cache(maxsize=None)
def _build_pc_call(n_chunks, blocks_per_chunk, block_rows, n_pad):
    num_steps = block_rows // SUB
    unroll = 2 if (num_steps >= 2 and num_steps % 2 == 0) else 1
    kernel = functools.partial(_pc_kernel, num_steps=num_steps, unroll=unroll)

    def pair_map(c, p):
        return (c * blocks_per_chunk + p, 0)

    grid_spec = pltpu.PrefetchScalarGridSpec(
        num_scalar_prefetch=0,
        grid=(n_chunks, blocks_per_chunk),
        in_specs=[
            pl.BlockSpec((block_rows, LANE), pair_map),           # distances
            pl.BlockSpec((block_rows, LANE), pair_map),           # idx_i
            pl.BlockSpec((block_rows, LANE), pair_map),           # idx_j
            pl.BlockSpec((1, n_pad), lambda c, p: (0, 0)),        # q (full row)
        ],
        out_specs=pl.BlockSpec((None, 1, n_pad), lambda c, p: (c, 0, 0)),
    )
    n_pairs_pad = n_chunks * blocks_per_chunk * block_rows * LANE
    cost = pl.CostEstimate(
        # Two one-hot matmuls (~4*N_PAD flops/pair) + ~40 VPU flops/pair; pair
        # tiles are streamed exactly once (no atom-axis re-reads).
        flops=n_pairs_pad * (4 * n_pad + 40),
        transcendentals=2 * n_pairs_pad,
        bytes_accessed=4 * (3 * n_pairs_pad + n_pad + n_chunks * n_pad),
    )
    return pl.pallas_call(
        kernel,
        out_shape=jax.ShapeDtypeStruct((n_chunks, 1, n_pad), jnp.float32),
        grid_spec=grid_spec,
        compiler_params=pltpu.CompilerParams(
            dimension_semantics=("parallel", "arbitrary"),  # pair chunks -> 2 TCs (v7x)
            vmem_limit_bytes=32 * 1024 * 1024,
        ),
        cost_estimate=cost,
    )


def _round_up(x, m):
    return ((x + m - 1) // m) * m


def pc_shielded_electrostatics(atomic_charges, distances, idx_i, idx_j,
                               *, min_blocks_per_chunk=1):
    """Forward pass of PC_shielded_electrostatics: per-atom electrostatic energies."""
    n_atoms = atomic_charges.shape[0]
    n_pairs = distances.shape[0]
    if n_atoms > N_PAD:
        # TODO(synk): atom-axis blocking + sorted/scalar-prefetched pair ranges for N > 128.
        raise NotImplementedError("toy kernel supports up to 128 atoms")

    # Geometry: sublane-dense (rows, 128) pair layout, large pair blocks.
    rows_needed = max(1, pl.cdiv(n_pairs, LANE))
    block_rows = min(MAX_BLOCK_ROWS, _round_up(rows_needed, SUB))
    blocks_needed = pl.cdiv(rows_needed, block_rows)
    blocks_per_chunk = max(int(min_blocks_per_chunk), pl.cdiv(blocks_needed, N_CHUNKS))
    total_rows = N_CHUNKS * blocks_per_chunk * block_rows
    p_pad = total_rows * LANE
    pad_p = p_pad - n_pairs

    # Padded pairs: d = 2*cutoff (masked to exactly zero in-kernel), idx = 0.
    d_pad = jnp.concatenate([distances.astype(jnp.float32),
                             jnp.full((pad_p,), 2.0 * CUTOFF, jnp.float32)])
    ii_pad = jnp.concatenate([idx_i.astype(jnp.int32), jnp.zeros((pad_p,), jnp.int32)])
    jj_pad = jnp.concatenate([idx_j.astype(jnp.int32), jnp.zeros((pad_p,), jnp.int32)])

    d2 = d_pad.reshape(total_rows, LANE)
    ii2 = ii_pad.reshape(total_rows, LANE)
    jj2 = jj_pad.reshape(total_rows, LANE)
    q_row = jnp.zeros((1, N_PAD), jnp.float32).at[0, :n_atoms].set(
        atomic_charges.astype(jnp.float32))

    call = _build_pc_call(N_CHUNKS, blocks_per_chunk, block_rows, N_PAD)
    partial = call(d2, ii2, jj2, q_row)                 # (N_CHUNKS, 1, N_PAD)

    # q_i and kehalf factored out of the pair sum: E_a = kehalf * q_a * sum q_j f(d).
    # Tiny (N,)-sized combine of the per-chunk partial sums in XLA.
    energies = KEHALF * q_row[0] * jnp.sum(partial[:, 0, :], axis=0)
    return energies[:n_atoms]


# ----------------------------------------------------------------------------
# Pure-JAX reference (matches torch forward semantics)
# ----------------------------------------------------------------------------
def reference(atomic_charges, distances, idx_i, idx_j, n_atoms):
    q_i = atomic_charges[idx_i]
    q_j = atomic_charges[idx_j]
    d = distances
    d_sh = jnp.sqrt(d ** 2 + 1.0)
    x = d / CUTOFF_SHORT
    sw_off = jnp.where(x < 1.0, 1.0 - 6.0 * x ** 5 + 15.0 * x ** 4 - 10.0 * x ** 3,
                       jnp.zeros_like(x))
    sw_on = 1.0 - sw_off
    if SPLIT_DISTANCE:
        e_ord = 1.0 / d + d / CUTOFF_SQ - 2.0 / CUTOFF
        e_shd = 1.0 / d_sh + d_sh / CUTOFF_SQ - 2.0 / CUTOFF
    else:
        e_ord = 1.0 / d
        e_shd = 1.0 / d_sh
    e = KEHALF * q_i * q_j * (sw_off * e_shd + sw_on * e_ord)
    e = jnp.where(d <= CUTOFF, e, jnp.zeros_like(e))
    return jax.ops.segment_sum(e, idx_i, num_segments=n_atoms)


if __name__ == "__main__":
    key = jax.random.PRNGKey(0)
    k1, k2 = jax.random.split(key)

    N_ATOMS = 8
    ii, jj = jnp.meshgrid(jnp.arange(N_ATOMS), jnp.arange(N_ATOMS), indexing="ij")
    mask = ii != jj
    idx_i = ii[mask].astype(jnp.int32)           # 56 ordered pairs i != j
    idx_j = jj[mask].astype(jnp.int32)
    n_real = idx_i.shape[0]

    atomic_charges = jax.random.normal(k1, (N_ATOMS,), dtype=jnp.float32)
    distances = jax.random.uniform(k2, (n_real,), minval=0.8, maxval=10.0,
                                   dtype=jnp.float32)

    # min_blocks_per_chunk=2 -> grid (2, 2): exercises both the "parallel" pair-chunk
    # axis (v7x megacore split) and the "arbitrary" reduction accumulator.
    out = pc_shielded_electrostatics(atomic_charges, distances, idx_i, idx_j,
                                     min_blocks_per_chunk=2)
    out = jax.block_until_ready(out)

    ref = reference(atomic_charges, distances, idx_i, idx_j, N_ATOMS)
    assert out.shape == (N_ATOMS,)
    assert jnp.allclose(out, ref, rtol=1e-5, atol=1e-5), (out, ref)

    print("KERNEL_OK")
</pallas_src>

<mosaic_0001>
module attributes {stable_mosaic.version = 11 : i64} {
  func.func @_pc_kernel(%arg0: i32, %arg1: i32, %arg2: memref<8x128xf32, #tpu.memory_space<vmem>>, %arg3: memref<8x128xi32, #tpu.memory_space<vmem>>, %arg4: memref<8x128xi32, #tpu.memory_space<vmem>>, %arg5: memref<1x128xf32, #tpu.memory_space<vmem>>, %arg6: memref<1x1x128xf32, #tpu.memory_space<vmem>>) attributes {dimension_semantics = [#tpu.dimension_semantics<parallel>, #tpu.dimension_semantics<arbitrary>], iteration_bounds = array<i64: 2, 2>, scalar_prefetch = 0 : i64, scratch_operands = 0 : i64, tpu.core_type = #tpu.core_type<tc>, window_params = [{transform_indices = @transform_0, window_bounds = array<i64: 8, 128>}, {transform_indices = @transform_1, window_bounds = array<i64: 8, 128>}, {transform_indices = @transform_2, window_bounds = array<i64: 8, 128>}, {pipeline_mode = #tpu.pipeline_mode<synchronous>, transform_indices = @transform_3, window_bounds = array<i64: 1, 128>}, {transform_indices = @transform_4, window_bounds = array<i64: 1, 1, 128>}]} {
    %c0_i32 = arith.constant 0 : i32
    %0 = arith.cmpi eq, %arg1, %c0_i32 : i32
    %1 = arith.extui %0 : i1 to i32
    %c0_i32_0 = arith.constant 0 : i32
    %2 = arith.cmpi ne, %1, %c0_i32_0 : i32
    scf.if %2 {
      %cst_80 = arith.constant 0.000000e+00 : f32
      %288 = vector.broadcast %cst_80 : f32 to vector<1x128xf32>
      %c0_81 = arith.constant 0 : index
      %c0_82 = arith.constant 0 : index
      %c0_83 = arith.constant 0 : index
      %289 = vector.load %arg6[%c0_81, %c0_82, %c0_83] : memref<1x1x128xf32, #tpu.memory_space<vmem>>, vector<1x1x128xf32>
      %290 = vector.shape_cast %289 : vector<1x1x128xf32> to vector<1x128xf32>
      %291 = vector.shape_cast %288 : vector<1x128xf32> to vector<1x1x128xf32>
      tpu.vector_store %arg6[%c0_81, %c0_82, %c0_83], %291 {strides = array<i32>} : memref<1x1x128xf32, #tpu.memory_space<vmem>>, vector<1x1x128xf32>,
    } else {
    }
    %c0 = arith.constant 0 : index
    %c0_1 = arith.constant 0 : index
    %3 = vector.load %arg5[%c0, %c0_1] : memref<1x128xf32, #tpu.memory_space<vmem>>, vector<1x128xf32>
    %4 = tpu.iota {dimensions = array<i32: 0>} : vector<128x256xi32>
    %cst = arith.constant 0.000000e+00 : f32
    %5 = vector.broadcast %cst : f32 to vector<1x128xf32>
    %c0_i32_2 = arith.constant 0 : i32
    %c8_i32 = arith.constant 8 : i32
    %6 = arith.muli %c0_i32_2, %c8_i32 : i32
    %7 = tpu.assume_multiple %6, 8 : i32
    %8 = arith.index_cast %7 : i32 to index
    %c0_3 = arith.constant 0 : index
    %9 = vector.load %arg2[%8, %c0_3] : memref<8x128xf32, #tpu.memory_space<vmem>>, vector<8x128xf32>
    %10 = arith.index_cast %7 : i32 to index
    %c0_4 = arith.constant 0 : index
    %11 = vector.load %arg3[%10, %c0_4] : memref<8x128xi32, #tpu.memory_space<vmem>>, vector<8x128xi32>
    %12 = arith.index_cast %7 : i32 to index
    %c0_5 = arith.constant 0 : index
    %13 = vector.load %arg4[%12, %c0_5] : memref<8x128xi32, #tpu.memory_space<vmem>>, vector<8x128xi32>
    %14 = vector.extract_strided_slice %9 {offsets = [0, 0], sizes = [1, 128], strides = [1, 1]} : vector<8x128xf32> to vector<1x128xf32>
    %15 = vector.extract_strided_slice %9 {offsets = [1, 0], sizes = [1, 128], strides = [1, 1]} : vector<8x128xf32> to vector<1x128xf32>
    %16 = tpu.concatenate %14, %15 in 1 : vector<1x128xf32>, vector<1x128xf32> -> vector<1x256xf32>
    %17 = vector.extract_strided_slice %11 {offsets = [0, 0], sizes = [1, 128], strides = [1, 1]} : vector<8x128xi32> to vector<1x128xi32>
    %18 = vector.extract_strided_slice %11 {offsets = [1, 0], sizes = [1, 128], strides = [1, 1]} : vector<8x128xi32> to vector<1x128xi32>
    %19 = tpu.concatenate %17, %18 in 1 : vector<1x128xi32>, vector<1x128xi32> -> vector<1x256xi32>
    %20 = vector.extract_strided_slice %13 {offsets = [0, 0], sizes = [1, 128], strides = [1, 1]} : vector<8x128xi32> to vector<1x128xi32>
    %21 = vector.extract_strided_slice %13 {offsets = [1, 0], sizes = [1, 128], strides = [1, 1]} : vector<8x128xi32> to vector<1x128xi32>
    %22 = tpu.concatenate %20, %21 in 1 : vector<1x128xi32>, vector<1x128xi32> -> vector<1x256xi32>
    %23 = tpu.reciprocal %16 {approx = true} : vector<1x256xf32> -> vector<1x256xf32>
    %24 = arith.mulf %16, %23 : vector<1x256xf32>
    %cst_6 = arith.constant 2.000000e+00 : f32
    %25 = vector.broadcast %cst_6 : f32 to vector<1x256xf32>
    %26 = arith.subf %25, %24 : vector<1x256xf32>
    %27 = arith.mulf %23, %26 : vector<1x256xf32>
    %28 = arith.mulf %16, %16 : vector<1x256xf32>
    %cst_7 = arith.constant 1.000000e+00 : f32
    %29 = vector.broadcast %cst_7 : f32 to vector<1x256xf32>
    %30 = arith.addf %28, %29 : vector<1x256xf32>
    %31 = math.rsqrt %30 : vector<1x256xf32>
    %32 = arith.mulf %30, %31 : vector<1x256xf32>
    %cst_8 = arith.constant 1.562500e-02 : f32
    %33 = vector.broadcast %cst_8 : f32 to vector<1x256xf32>
    %34 = arith.mulf %16, %33 : vector<1x256xf32>
    %35 = arith.addf %27, %34 : vector<1x256xf32>
    %cst_9 = arith.constant 2.500000e-01 : f32
    %36 = vector.broadcast %cst_9 : f32 to vector<1x256xf32>
    %37 = arith.subf %35, %36 : vector<1x256xf32>
    %cst_10 = arith.constant 1.562500e-02 : f32
    %38 = vector.broadcast %cst_10 : f32 to vector<1x256xf32>
    %39 = arith.mulf %32, %38 : vector<1x256xf32>
    %40 = arith.addf %31, %39 : vector<1x256xf32>
    %cst_11 = arith.constant 2.500000e-01 : f32
    %41 = vector.broadcast %cst_11 : f32 to vector<1x256xf32>
    %42 = arith.subf %40, %41 : vector<1x256xf32>
    %cst_12 = arith.constant 2.500000e-01 : f32
    %43 = vector.broadcast %cst_12 : f32 to vector<1x256xf32>
    %44 = arith.mulf %16, %43 : vector<1x256xf32>
    %45 = arith.mulf %44, %44 : vector<1x256xf32>
    %46 = arith.mulf %45, %44 : vector<1x256xf32>
    %cst_13 = arith.constant 6.000000e+00 : f32
    %47 = vector.broadcast %cst_13 : f32 to vector<1x256xf32>
    %48 = arith.mulf %47, %44 : vector<1x256xf32>
    %49 = arith.mulf %48, %44 : vector<1x256xf32>
    %cst_14 = arith.constant 1.500000e+01 : f32
    %50 = vector.broadcast %cst_14 : f32 to vector<1x256xf32>
    %51 = arith.mulf %50, %44 : vector<1x256xf32>
    %52 = arith.subf %49, %51 : vector<1x256xf32>
    %cst_15 = arith.constant 1.000000e+01 : f32
    %53 = vector.broadcast %cst_15 : f32 to vector<1x256xf32>
    %54 = arith.addf %52, %53 : vector<1x256xf32>
    %55 = arith.mulf %46, %54 : vector<1x256xf32>
    %cst_16 = arith.constant 1.000000e+00 : f32
    %56 = vector.broadcast %cst_16 : f32 to vector<1x256xf32>
    %57 = arith.subf %56, %55 : vector<1x256xf32>
    %cst_17 = arith.constant 1.000000e+00 : f32
    %58 = vector.broadcast %cst_17 : f32 to vector<1x256xf32>
    %59 = arith.cmpf olt, %44, %58 : vector<1x256xf32>
    %cst_18 = arith.constant 0.000000e+00 : f32
    %60 = vector.broadcast %cst_18 : f32 to vector<1x256xf32>
    %61 = arith.select %59, %57, %60 : vector<1x256xi1>, vector<1x256xf32>
    %62 = arith.subf %42, %37 : vector<1x256xf32>
    %63 = arith.mulf %61, %62 : vector<1x256xf32>
    %64 = arith.addf %37, %63 : vector<1x256xf32>
    %cst_19 = arith.constant 8.000000e+00 : f32
    %65 = vector.broadcast %cst_19 : f32 to vector<1x256xf32>
    %66 = arith.cmpf ole, %16, %65 : vector<1x256xf32>
    %cst_20 = arith.constant 0.000000e+00 : f32
    %67 = vector.broadcast %cst_20 : f32 to vector<1x256xf32>
    %68 = arith.select %66, %64, %67 : vector<1x256xi1>, vector<1x256xf32>
    %69 = vector.broadcast %22 : vector<1x256xi32> to vector<128x256xi32>
    %70 = arith.cmpi eq, %69, %4 : vector<128x256xi32>
    %71 = arith.extui %70 : vector<128x256xi1> to vector<128x256xi32>
    %72 = arith.sitofp %71 : vector<128x256xi32> to vector<128x256xf32>
    %cst_21 = arith.constant dense<0.000000e+00> : vector<1x256xf32>
    %73 = tpu.matmul %3, %72, %cst_21 {dimension_numbers = #tpu.dot_dimension_numbers<[1], [0], [0], [1], [0, 0, 1, 1], [], []>} : vector<1x128xf32>, vector<128x256xf32>, vector<1x256xf32> -> vector<1x256xf32>
    %74 = arith.mulf %73, %68 : vector<1x256xf32>
    %75 = vector.broadcast %19 : vector<1x256xi32> to vector<128x256xi32>
    %76 = arith.cmpi eq, %75, %4 : vector<128x256xi32>
    %77 = arith.extui %76 : vector<128x256xi1> to vector<128x256xi32>
    %78 = arith.sitofp %77 : vector<128x256xi32> to vector<128x256xf32>
    %cst_22 = arith.constant dense<0.000000e+00> : vector<1x128xf32>
    %79 = tpu.matmul %74, %78, %cst_22 {dimension_numbers = #tpu.dot_dimension_numbers<[1], [1], [0], [0], [0, 0, 1, 0], [], []>} : vector<1x256xf32>, vector<128x256xf32>, vector<1x128xf32> -> vector<1x128xf32>
    %80 = arith.addf %5, %79 : vector<1x128xf32>
    %81 = vector.extract_strided_slice %9 {offsets = [2, 0], sizes = [1, 128], strides = [1, 1]} : vector<8x128xf32> to vector<1x128xf32>
    %82 = vector.extract_strided_slice %9 {offsets = [3, 0], sizes = [1, 128], strides = [1, 1]} : vector<8x128xf32> to vector<1x128xf32>
    %83 = tpu.concatenate %81, %82 in 1 : vector<1x128xf32>, vector<1x128xf32> -> vector<1x256xf32>
    %84 = vector.extract_strided_slice %11 {offsets = [2, 0], sizes = [1, 128], strides = [1, 1]} : vector<8x128xi32> to vector<1x128xi32>
    %85 = vector.extract_strided_slice %11 {offsets = [3, 0], sizes = [1, 128], strides = [1, 1]} : vector<8x128xi32> to vector<1x128xi32>
    %86 = tpu.concatenate %84, %85 in 1 : vector<1x128xi32>, vector<1x128xi32> -> vector<1x256xi32>
    %87 = vector.extract_strided_slice %13 {offsets = [2, 0], sizes = [1, 128], strides = [1, 1]} : vector<8x128xi32> to vector<1x128xi32>
    %88 = vector.extract_strided_slice %13 {offsets = [3, 0], sizes = [1, 128], strides = [1, 1]} : vector<8x128xi32> to vector<1x128xi32>
    %89 = tpu.concatenate %87, %88 in 1 : vector<1x128xi32>, vector<1x128xi32> -> vector<1x256xi32>
    %90 = tpu.reciprocal %83 {approx = true} : vector<1x256xf32> -> vector<1x256xf32>
    %91 = arith.mulf %83, %90 : vector<1x256xf32>
    %cst_23 = arith.constant 2.000000e+00 : f32
    %92 = vector.broadcast %cst_23 : f32 to vector<1x256xf32>
    %93 = arith.subf %92, %91 : vector<1x256xf32>
    %94 = arith.mulf %90, %93 : vector<1x256xf32>
    %95 = arith.mulf %83, %83 : vector<1x256xf32>
    %cst_24 = arith.constant 1.000000e+00 : f32
    %96 = vector.broadcast %cst_24 : f32 to vector<1x256xf32>
    %97 = arith.addf %95, %96 : vector<1x256xf32>
    %98 = math.rsqrt %97 : vector<1x256xf32>
    %99 = arith.mulf %97, %98 : vector<1x256xf32>
    %cst_25 = arith.constant 1.562500e-02 : f32
    %100 = vector.broadcast %cst_25 : f32 to vector<1x256xf32>
    %101 = arith.mulf %83, %100 : vector<1x256xf32>
    %102 = arith.addf %94, %101 : vector<1x256xf32>
    %cst_26 = arith.constant 2.500000e-01 : f32
    %103 = vector.broadcast %cst_26 : f32 to vector<1x256xf32>
    %104 = arith.subf %102, %103 : vector<1x256xf32>
    %cst_27 = arith.constant 1.562500e-02 : f32
    %105 = vector.broadcast %cst_27 : f32 to vector<1x256xf32>
    %106 = arith.mulf %99, %105 : vector<1x256xf32>
    %107 = arith.addf %98, %106 : vector<1x256xf32>
    %cst_28 = arith.constant 2.500000e-01 : f32
    %108 = vector.broadcast %cst_28 : f32 to vector<1x256xf32>
    %109 = arith.subf %107, %108 : vector<1x256xf32>
    %cst_29 = arith.constant 2.500000e-01 : f32
    %110 = vector.broadcast %cst_29 : f32 to vector<1x256xf32>
    %111 = arith.mulf %83, %110 : vector<1x256xf32>
    %112 = arith.mulf %111, %111 : vector<1x256xf32>
    %113 = arith.mulf %112, %111 : vector<1x256xf32>
    %cst_30 = arith.constant 6.000000e+00 : f32
    %114 = vector.broadcast %cst_30 : f32 to vector<1x256xf32>
    %115 = arith.mulf %114, %111 : vector<1x256xf32>
    %116 = arith.mulf %115, %111 : vector<1x256xf32>
    %cst_31 = arith.constant 1.500000e+01 : f32
    %117 = vector.broadcast %cst_31 : f32 to vector<1x256xf32>
    %118 = arith.mulf %117, %111 : vector<1x256xf32>
    %119 = arith.subf %116, %118 : vector<1x256xf32>
    %cst_32 = arith.constant 1.000000e+01 : f32
    %120 = vector.broadcast %cst_32 : f32 to vector<1x256xf32>
    %121 = arith.addf %119, %120 : vector<1x256xf32>
    %122 = arith.mulf %113, %121 : vector<1x256xf32>
    %cst_33 = arith.constant 1.000000e+00 : f32
    %123 = vector.broadcast %cst_33 : f32 to vector<1x256xf32>
    %124 = arith.subf %123, %122 : vector<1x256xf32>
    %cst_34 = arith.constant 1.000000e+00 : f32
    %125 = vector.broadcast %cst_34 : f32 to vector<1x256xf32>
    %126 = arith.cmpf olt, %111, %125 : vector<1x256xf32>
    %cst_35 = arith.constant 0.000000e+00 : f32
    %127 = vector.broadcast %cst_35 : f32 to vector<1x256xf32>
    %128 = arith.select %126, %124, %127 : vector<1x256xi1>, vector<1x256xf32>
    %129 = arith.subf %109, %104 : vector<1x256xf32>
    %130 = arith.mulf %128, %129 : vector<1x256xf32>
    %131 = arith.addf %104, %130 : vector<1x256xf32>
    %cst_36 = arith.constant 8.000000e+00 : f32
    %132 = vector.broadcast %cst_36 : f32 to vector<1x256xf32>
    %133 = arith.cmpf ole, %83, %132 : vector<1x256xf32>
    %cst_37 = arith.constant 0.000000e+00 : f32
    %134 = vector.broadcast %cst_37 : f32 to vector<1x256xf32>
    %135 = arith.select %133, %131, %134 : vector<1x256xi1>, vector<1x256xf32>
    %136 = vector.broadcast %89 : vector<1x256xi32> to vector<128x256xi32>
    %137 = arith.cmpi eq, %136, %4 : vector<128x256xi32>
    %138 = arith.extui %137 : vector<128x256xi1> to vector<128x256xi32>
    %139 = arith.sitofp %138 : vector<128x256xi32> to vector<128x256xf32>
    %cst_38 = arith.constant dense<0.000000e+00> : vector<1x256xf32>
    %140 = tpu.matmul %3, %139, %cst_38 {dimension_numbers = #tpu.dot_dimension_numbers<[1], [0], [0], [1], [0, 0, 1, 1], [], []>} : vector<1x128xf32>, vector<128x256xf32>, vector<1x256xf32> -> vector<1x256xf32>
    %141 = arith.mulf %140, %135 : vector<1x256xf32>
    %142 = vector.broadcast %86 : vector<1x256xi32> to vector<128x256xi32>
    %143 = arith.cmpi eq, %142, %4 : vector<128x256xi32>
    %144 = arith.extui %143 : vector<128x256xi1> to vector<128x256xi32>
    %145 = arith.sitofp %144 : vector<128x256xi32> to vector<128x256xf32>
    %cst_39 = arith.constant dense<0.000000e+00> : vector<1x128xf32>
    %146 = tpu.matmul %141, %145, %cst_39 {dimension_numbers = #tpu.dot_dimension_numbers<[1], [1], [0], [0], [0, 0, 1, 0], [], []>} : vector<1x256xf32>, vector<128x256xf32>, vector<1x128xf32> -> vector<1x128xf32>
    %147 = arith.addf %80, %146 : vector<1x128xf32>
    %148 = vector.extract_strided_slice %9 {offsets = [4, 0], sizes = [1, 128], strides = [1, 1]} : vector<8x128xf32> to vector<1x128xf32>
    %149 = vector.extract_strided_slice %9 {offsets = [5, 0], sizes = [1, 128], strides = [1, 1]} : vector<8x128xf32> to vector<1x128xf32>
    %150 = tpu.concatenate %148, %149 in 1 : vector<1x128xf32>, vector<1x128xf32> -> vector<1x256xf32>
    %151 = vector.extract_strided_slice %11 {offsets = [4, 0], sizes = [1, 128], strides = [1, 1]} : vector<8x128xi32> to vector<1x128xi32>
    %152 = vector.extract_strided_slice %11 {offsets = [5, 0], sizes = [1, 128], strides = [1, 1]} : vector<8x128xi32> to vector<1x128xi32>
    %153 = tpu.concatenate %151, %152 in 1 : vector<1x128xi32>, vector<1x128xi32> -> vector<1x256xi32>
    %154 = vector.extract_strided_slice %13 {offsets = [4, 0], sizes = [1, 128], strides = [1, 1]} : vector<8x128xi32> to vector<1x128xi32>
    %155 = vector.extract_strided_slice %13 {offsets = [5, 0], sizes = [1, 128], strides = [1, 1]} : vector<8x128xi32> to vector<1x128xi32>
    %156 = tpu.concatenate %154, %155 in 1 : vector<1x128xi32>, vector<1x128xi32> -> vector<1x256xi32>
    %157 = tpu.reciprocal %150 {approx = true} : vector<1x256xf32> -> vector<1x256xf32>
    %158 = arith.mulf %150, %157 : vector<1x256xf32>
    %cst_40 = arith.constant 2.000000e+00 : f32
    %159 = vector.broadcast %cst_40 : f32 to vector<1x256xf32>
    %160 = arith.subf %159, %158 : vector<1x256xf32>
    %161 = arith.mulf %157, %160 : vector<1x256xf32>
    %162 = arith.mulf %150, %150 : vector<1x256xf32>
    %cst_41 = arith.constant 1.000000e+00 : f32
    %163 = vector.broadcast %cst_41 : f32 to vector<1x256xf32>
    %164 = arith.addf %162, %163 : vector<1x256xf32>
    %165 = math.rsqrt %164 : vector<1x256xf32>
    %166 = arith.mulf %164, %165 : vector<1x256xf32>
    %cst_42 = arith.constant 1.562500e-02 : f32
    %167 = vector.broadcast %cst_42 : f32 to vector<1x256xf32>
    %168 = arith.mulf %150, %167 : vector<1x256xf32>
    %169 = arith.addf %161, %168 : vector<1x256xf32>
    %cst_43 = arith.constant 2.500000e-01 : f32
    %170 = vector.broadcast %cst_43 : f32 to vector<1x256xf32>
    %171 = arith.subf %169, %170 : vector<1x256xf32>
    %cst_44 = arith.constant 1.562500e-02 : f32
    %172 = vector.broadcast %cst_44 : f32 to vector<1x256xf32>
    %173 = arith.mulf %166, %172 : vector<1x256xf32>
    %174 = arith.addf %165, %173 : vector<1x256xf32>
    %cst_45 = arith.constant 2.500000e-01 : f32
    %175 = vector.broadcast %cst_45 : f32 to vector<1x256xf32>
    %176 = arith.subf %174, %175 : vector<1x256xf32>
    %cst_46 = arith.constant 2.500000e-01 : f32
    %177 = vector.broadcast %cst_46 : f32 to vector<1x256xf32>
    %178 = arith.mulf %150, %177 : vector<1x256xf32>
    %179 = arith.mulf %178, %178 : vector<1x256xf32>
    %180 = arith.mulf %179, %178 : vector<1x256xf32>
    %cst_47 = arith.constant 6.000000e+00 : f32
    %181 = vector.broadcast %cst_47 : f32 to vector<1x256xf32>
    %182 = arith.mulf %181, %178 : vector<1x256xf32>
    %183 = arith.mulf %182, %178 : vector<1x256xf32>
    %cst_48 = arith.constant 1.500000e+01 : f32
    %184 = vector.broadcast %cst_48 : f32 to vector<1x256xf32>
    %185 = arith.mulf %184, %178 : vector<1x256xf32>
    %186 = arith.subf %183, %185 : vector<1x256xf32>
    %cst_49 = arith.constant 1.000000e+01 : f32
    %187 = vector.broadcast %cst_49 : f32 to vector<1x256xf32>
    %188 = arith.addf %186, %187 : vector<1x256xf32>
    %189 = arith.mulf %180, %188 : vector<1x256xf32>
    %cst_50 = arith.constant 1.000000e+00 : f32
    %190 = vector.broadcast %cst_50 : f32 to vector<1x256xf32>
    %191 = arith.subf %190, %189 : vector<1x256xf32>
    %cst_51 = arith.constant 1.000000e+00 : f32
    %192 = vector.broadcast %cst_51 : f32 to vector<1x256xf32>
    %193 = arith.cmpf olt, %178, %192 : vector<1x256xf32>
    %cst_52 = arith.constant 0.000000e+00 : f32
    %194 = vector.broadcast %cst_52 : f32 to vector<1x256xf32>
    %195 = arith.select %193, %191, %194 : vector<1x256xi1>, vector<1x256xf32>
    %196 = arith.subf %176, %171 : vector<1x256xf32>
    %197 = arith.mulf %195, %196 : vector<1x256xf32>
    %198 = arith.addf %171, %197 : vector<1x256xf32>
    %cst_53 = arith.constant 8.000000e+00 : f32
    %199 = vector.broadcast %cst_53 : f32 to vector<1x256xf32>
    %200 = arith.cmpf ole, %150, %199 : vector<1x256xf32>
    %cst_54 = arith.constant 0.000000e+00 : f32
    %201 = vector.broadcast %cst_54 : f32 to vector<1x256xf32>
    %202 = arith.select %200, %198, %201 : vector<1x256xi1>, vector<1x256xf32>
    %203 = vector.broadcast %156 : vector<1x256xi32> to vector<128x256xi32>
    %204 = arith.cmpi eq, %203, %4 : vector<128x256xi32>
    %205 = arith.extui %204 : vector<128x256xi1> to vector<128x256xi32>
    %206 = arith.sitofp %205 : vector<128x256xi32> to vector<128x256xf32>
    %cst_55 = arith.constant dense<0.000000e+00> : vector<1x256xf32>
    %207 = tpu.matmul %3, %206, %cst_55 {dimension_numbers = #tpu.dot_dimension_numbers<[1], [0], [0], [1], [0, 0, 1, 1], [], []>} : vector<1x128xf32>, vector<128x256xf32>, vector<1x256xf32> -> vector<1x256xf32>
    %208 = arith.mulf %207, %202 : vector<1x256xf32>
    %209 = vector.broadcast %153 : vector<1x256xi32> to vector<128x256xi32>
    %210 = arith.cmpi eq, %209, %4 : vector<128x256xi32>
    %211 = arith.extui %210 : vector<128x256xi1> to vector<128x256xi32>
    %212 = arith.sitofp %211 : vector<128x256xi32> to vector<128x256xf32>
    %cst_56 = arith.constant dense<0.000000e+00> : vector<1x128xf32>
    %213 = tpu.matmul %208, %212, %cst_56 {dimension_numbers = #tpu.dot_dimension_numbers<[1], [1], [0], [0], [0, 0, 1, 0], [], []>} : vector<1x256xf32>, vector<128x256xf32>, vector<1x128xf32> -> vector<1x128xf32>
    %214 = arith.addf %147, %213 : vector<1x128xf32>
    %215 = vector.extract_strided_slice %9 {offsets = [6, 0], sizes = [1, 128], strides = [1, 1]} : vector<8x128xf32> to vector<1x128xf32>
    %216 = vector.extract_strided_slice %9 {offsets = [7, 0], sizes = [1, 128], strides = [1, 1]} : vector<8x128xf32> to vector<1x128xf32>
    %217 = tpu.concatenate %215, %216 in 1 : vector<1x128xf32>, vector<1x128xf32> -> vector<1x256xf32>
    %218 = vector.extract_strided_slice %11 {offsets = [6, 0], sizes = [1, 128], strides = [1, 1]} : vector<8x128xi32> to vector<1x128xi32>
    %219 = vector.extract_strided_slice %11 {offsets = [7, 0], sizes = [1, 128], strides = [1, 1]} : vector<8x128xi32> to vector<1x128xi32>
    %220 = tpu.concatenate %218, %219 in 1 : vector<1x128xi32>, vector<1x128xi32> -> vector<1x256xi32>
    %221 = vector.extract_strided_slice %13 {offsets = [6, 0], sizes = [1, 128], strides = [1, 1]} : vector<8x128xi32> to vector<1x128xi32>
    %222 = vector.extract_strided_slice %13 {offsets = [7, 0], sizes = [1, 128], strides = [1, 1]} : vector<8x128xi32> to vector<1x128xi32>
    %223 = tpu.concatenate %221, %222 in 1 : vector<1x128xi32>, vector<1x128xi32> -> vector<1x256xi32>
    %224 = tpu.reciprocal %217 {approx = true} : vector<1x256xf32> -> vector<1x256xf32>
    %225 = arith.mulf %217, %224 : vector<1x256xf32>
    %cst_57 = arith.constant 2.000000e+00 : f32
    %226 = vector.broadcast %cst_57 : f32 to vector<1x256xf32>
    %227 = arith.subf %226, %225 : vector<1x256xf32>
    %228 = arith.mulf %224, %227 : vector<1x256xf32>
    %229 = arith.mulf %217, %217 : vector<1x256xf32>
    %cst_58 = arith.constant 1.000000e+00 : f32
    %230 = vector.broadcast %cst_58 : f32 to vector<1x256xf32>
    %231 = arith.addf %229, %230 : vector<1x256xf32>
    %232 = math.rsqrt %231 : vector<1x256xf32>
    %233 = arith.mulf %231, %232 : vector<1x256xf32>
    %cst_59 = arith.constant 1.562500e-02 : f32
    %234 = vector.broadcast %cst_59 : f32 to vector<1x256xf32>
    %235 = arith.mulf %217, %234 : vector<1x256xf32>
    %236 = arith.addf %228, %235 : vector<1x256xf32>
    %cst_60 = arith.constant 2.500000e-01 : f32
    %237 = vector.broadcast %cst_60 : f32 to vector<1x256xf32>
    %238 = arith.subf %236, %237 : vector<1x256xf32>
    %cst_61 = arith.constant 1.562500e-02 : f32
    %239 = vector.broadcast %cst_61 : f32 to vector<1x256xf32>
    %240 = arith.mulf %233, %239 : vector<1x256xf32>
    %241 = arith.addf %232, %240 : vector<1x256xf32>
    %cst_62 = arith.constant 2.500000e-01 : f32
    %242 = vector.broadcast %cst_62 : f32 to vector<1x256xf32>
    %243 = arith.subf %241, %242 : vector<1x256xf32>
    %cst_63 = arith.constant 2.500000e-01 : f32
    %244 = vector.broadcast %cst_63 : f32 to vector<1x256xf32>
    %245 = arith.mulf %217, %244 : vector<1x256xf32>
    %246 = arith.mulf %245, %245 : vector<1x256xf32>
    %247 = arith.mulf %246, %245 : vector<1x256xf32>
    %cst_64 = arith.constant 6.000000e+00 : f32
    %248 = vector.broadcast %cst_64 : f32 to vector<1x256xf32>
    %249 = arith.mulf %248, %245 : vector<1x256xf32>
    %250 = arith.mulf %249, %245 : vector<1x256xf32>
    %cst_65 = arith.constant 1.500000e+01 : f32
    %251 = vector.broadcast %cst_65 : f32 to vector<1x256xf32>
    %252 = arith.mulf %251, %245 : vector<1x256xf32>
    %253 = arith.subf %250, %252 : vector<1x256xf32>
    %cst_66 = arith.constant 1.000000e+01 : f32
    %254 = vector.broadcast %cst_66 : f32 to vector<1x256xf32>
    %255 = arith.addf %253, %254 : vector<1x256xf32>
    %256 = arith.mulf %247, %255 : vector<1x256xf32>
    %cst_67 = arith.constant 1.000000e+00 : f32
    %257 = vector.broadcast %cst_67 : f32 to vector<1x256xf32>
    %258 = arith.subf %257, %256 : vector<1x256xf32>
    %cst_68 = arith.constant 1.000000e+00 : f32
    %259 = vector.broadcast %cst_68 : f32 to vector<1x256xf32>
    %260 = arith.cmpf olt, %245, %259 : vector<1x256xf32>
    %cst_69 = arith.constant 0.000000e+00 : f32
    %261 = vector.broadcast %cst_69 : f32 to vector<1x256xf32>
    %262 = arith.select %260, %258, %261 : vector<1x256xi1>, vector<1x256xf32>
    %263 = arith.subf %243, %238 : vector<1x256xf32>
    %264 = arith.mulf %262, %263 : vector<1x256xf32>
    %265 = arith.addf %238, %264 : vector<1x256xf32>
    %cst_70 = arith.constant 8.000000e+00 : f32
    %266 = vector.broadcast %cst_70 : f32 to vector<1x256xf32>
    %267 = arith.cmpf ole, %217, %266 : vector<1x256xf32>
    %cst_71 = arith.constant 0.000000e+00 : f32
    %268 = vector.broadcast %cst_71 : f32 to vector<1x256xf32>
    %269 = arith.select %267, %265, %268 : vector<1x256xi1>, vector<1x256xf32>
    %270 = vector.broadcast %223 : vector<1x256xi32> to vector<128x256xi32>
    %271 = arith.cmpi eq, %270, %4 : vector<128x256xi32>
    %272 = arith.extui %271 : vector<128x256xi1> to vector<128x256xi32>
    %273 = arith.sitofp %272 : vector<128x256xi32> to vector<128x256xf32>
    %cst_72 = arith.constant dense<0.000000e+00> : vector<1x256xf32>
    %274 = tpu.matmul %3, %273, %cst_72 {dimension_numbers = #tpu.dot_dimension_numbers<[1], [0], [0], [1], [0, 0, 1, 1], [], []>} : vector<1x128xf32>, vector<128x256xf32>, vector<1x256xf32> -> vector<1x256xf32>
    %275 = arith.mulf %274, %269 : vector<1x256xf32>
    %276 = vector.broadcast %220 : vector<1x256xi32> to vector<128x256xi32>
    %277 = arith.cmpi eq, %276, %4 : vector<128x256xi32>
    %278 = arith.extui %277 : vector<128x256xi1> to vector<128x256xi32>
    %279 = arith.sitofp %278 : vector<128x256xi32> to vector<128x256xf32>
    %cst_73 = arith.constant dense<0.000000e+00> : vector<1x128xf32>
    %280 = tpu.matmul %275, %279, %cst_73 {dimension_numbers = #tpu.dot_dimension_numbers<[1], [1], [0], [0], [0, 0, 1, 0], [], []>} : vector<1x256xf32>, vector<128x256xf32>, vector<1x128xf32> -> vector<1x128xf32>
    %281 = arith.addf %214, %280 : vector<1x128xf32>
    %c1_i32 = arith.constant 1 : i32
    %c0_74 = arith.constant 0 : index
    %c0_75 = arith.constant 0 : index
    %c0_76 = arith.constant 0 : index
    %282 = vector.load %arg6[%c0_74, %c0_75, %c0_76] : memref<1x1x128xf32, #tpu.memory_space<vmem>>, vector<1x1x128xf32>
    %283 = vector.shape_cast %282 : vector<1x1x128xf32> to vector<1x128xf32>
    %284 = arith.addf %283, %281 : vector<1x128xf32>
    %c0_77 = arith.constant 0 : index
    %c0_78 = arith.constant 0 : index
    %c0_79 = arith.constant 0 : index
    %285 = vector.load %arg6[%c0_77, %c0_78, %c0_79] : memref<1x1x128xf32, #tpu.memory_space<vmem>>, vector<1x1x128xf32>
    %286 = vector.shape_cast %285 : vector<1x1x128xf32> to vector<1x128xf32>
    %287 = vector.shape_cast %284 : vector<1x128xf32> to vector<1x1x128xf32>
    tpu.vector_store %arg6[%c0_77, %c0_78, %c0_79], %287 {strides = array<i32>} : memref<1x1x128xf32, #tpu.memory_space<vmem>>, vector<1x1x128xf32>,
    return
  }
  func.func @transform_0(%arg0: i32, %arg1: i32) -> (i32, i32) {
    %c2_i32 = arith.constant 2 : i32
    %0 = arith.muli %arg0, %c2_i32 : i32
    %1 = arith.addi %0, %arg1 : i32
    %c0_i32 = arith.constant 0 : i32
    %c0_i32_0 = arith.constant 0 : i32
    return %1, %c0_i32 : i32, i32
  }
  func.func @transform_1(%arg0: i32, %arg1: i32) -> (i32, i32) {
    %c2_i32 = arith.constant 2 : i32
    %0 = arith.muli %arg0, %c2_i32 : i32
    %1 = arith.addi %0, %arg1 : i32
    %c0_i32 = arith.constant 0 : i32
    %c0_i32_0 = arith.constant 0 : i32
    return %1, %c0_i32 : i32, i32
  }
  func.func @transform_2(%arg0: i32, %arg1: i32) -> (i32, i32) {
    %c2_i32 = arith.constant 2 : i32
    %0 = arith.muli %arg0, %c2_i32 : i32
    %1 = arith.addi %0, %arg1 : i32
    %c0_i32 = arith.constant 0 : i32
    %c0_i32_0 = arith.constant 0 : i32
    return %1, %c0_i32 : i32, i32
  }
  func.func @transform_3(%arg0: i32, %arg1: i32) -> (i32, i32) {
    %c0_i32 = arith.constant 0 : i32
    %c0_i32_0 = arith.constant 0 : i32
    %c0_i32_1 = arith.constant 0 : i32
    return %c0_i32, %c0_i32_0 : i32, i32
  }
  func.func @transform_4(%arg0: i32, %arg1: i32) -> (i32, i32, i32) {
    %c0_i32 = arith.constant 0 : i32
    %c0_i32_0 = arith.constant 0 : i32
    %c0_i32_1 = arith.constant 0 : i32
    return %arg0, %c0_i32, %c0_i32_0 : i32, i32, i32
  }
}

</mosaic_0001>

<bundles_post_ra>
// kernel: tpu_custom_call.1
= control target key start
LH: loop header
LB: loop body
LE: loop exit
PB: predicated region body
PF: predicated region fallthrough
CT: control target
= control target key end

     0   :  { %s4078_s0 = inlined_call_operand.hbm [shape: f32[32,128], index: 0, kind: input, shape index: {}]   ;;  %s4079_s1 = inlined_call_operand.hbm [shape: s32[32,128], index: 1, kind: input, shape index: {}]   ;;  %s4080_s2 = inlined_call_operand.hbm [shape: s32[32,128], index: 2, kind: input, shape index: {}]   ;;  %s4081_s3 = inlined_call_operand.vmem [shape: f32[1,128], index: 3, kind: input, shape index: {}]   ;;  %s4082_s4 = inlined_call_operand.hbm [shape: f32[2,1,128], index: 4, kind: output, shape index: {}]  }
   0x1   :  { %4089 = sst [smem:[#allocation19_spill]] %s4078_s0 }
   0x2   :  { %4090 = sst [smem:[#allocation20_spill]] %s4079_s1 }
   0x3   :  { %9 = vsyncpa [#allocation3], 0 }
   0x4   :  { %11 = vsyncpa [#allocation3 + $0x1], 0 }
   0x5   :  { %12 = vsyncpa [#allocation6], 0 }
   0x6   :  { %14 = vsyncpa [#allocation6 + $0x1], 0 }
   0x7   :  { %15 = vsyncpa [#allocation4], 0 }
   0x8   :  { %17 = vsyncpa [#allocation4 + $0x1], 0  ;;  %s2882_s15 = smov 0   ;;  %s2884_s16 = smov 0  }
   0x9   :  { %s2886_s17 = smov 0   ;;  %s2888_s18 = smov 0  }
   0xa   :  { %s2890_s19 = smov 0   ;;  %s2892_s20 = smov 0  }
   0xb   :  { %s2894_s21 = smov 0   ;;  %s2896_s22 = smov 0  }
   0xc   :  { %s2898_s23 = smov 0   ;;  %s2900_s24 = smov 0  }
   0xd   :  { %s2902_s25 = smov 0  }
   0xe LB: > { %4091 = sst [smem:[#allocation12_spill]] %s2816_s17  ;;  %s2936_s26 = sadd.s32 4294967295, %s2848_s25   ;;  %s2848_s25 = sphi %s2902_s25, %s23_s25   ;;  %s2844_s24 = sphi %s2900_s24, %s4113_s24   ;;  %s2840_s23 = sphi %s2898_s23, %s4112_s23   ;;  %s2836_s22 = sphi %s2896_s22, %s4111_s22   ;;  %s2832_s21 = sphi %s2894_s21, %s4110_s21   ;;  %s2828_s20 = sphi %s2892_s20, %s4118_s20   ;;  %s2824_s19 = sphi %s2890_s19, %s4117_s19   ;;  %s2820_s18 = sphi %s2888_s18, %s4116_s18   ;;  %s2816_s17 = sphi %s2886_s17, %s4108_s17   ;;  %s2812_s16 = sphi %s2884_s16, %s4115_s16   ;;  %s2808_s15 = sphi %s2882_s15, %s4114_s15  }
   0xf   : > { %4092 = sst [smem:[#allocation13_spill]] %s2840_s23  ;;  %s1975_s27 = sadd.s32 4294967294, %s2848_s25  }
  0x10   : > { %4093 = sst [smem:[#allocation14_spill]] %s2844_s24  ;;  %s32_s28 = sadd.s32 1, %s2840_s23 }
  0x11   : > { %s35_s29 = sadd.s32 1, %s2844_s24  ;;  %p33_p0 = scmp.ge.s32.totalorder %s32_s28, 2 }
  0x12   : > { %s1976_s30 = sshll.u32 %s2844_s24, 1  ;;  %s46_s6 = sadd.s32 1, %s2828_s20 }
  0x13   : > { %s2943_s5 = sadd.s32 %s2840_s23, %s1976_s30  ;;  %s4120_s28 = smov (%p33_p0, %s32_s28), 0 }
  0x14   : > { %4094 = sst [smem:[#allocation15_spill]] %s4120_s28  ;;  %s4122_s29 = smov (!%p33_p0, %s35_s29), %s2844_s24 }
  0x15   : > { %p53_p1 = scmp.ne.s32.totalorder %s2828_s20, %s2824_s19  ;;  %p54_p2 = scmp.eq.s32.totalorder %s2848_s25, 0 }
  0x16   : > { %p37_p3 = scmp.ge.s32.totalorder %s4122_s29, 2  ;;  %p59_p4 = scmp.ne.s32.totalorder %s2824_s19, %s2820_s18 }
  0x17   : > { %p2953_p5 = por %p54_p2, %p53_p1  ;;  %p60_p6 = scmp.eq.s32.totalorder %s2936_s26, 0 }
  0x18   : > { %s4124_s29 = smov (%p37_p3, %s4122_s29), 0  ;;  %s153_s9 = sadd.s32 1, %s2816_s17 }
  0x19   : > { %4096 = sst [smem:[#allocation16_spill]] %s4124_s29  ;;  %p2960_p7 = por %p60_p6, %p59_p4 }
  0x1a   : > { %s1977_s10 = sshll.u32 %s4124_s29, 1  ;;  %s150_s11 = ssub.s32 %s2844_s24, %s4124_s29 }
  0x1b   : > { %s42_s12 = sadd.s32 %s1977_s10, %s4120_s28  ;;  %p151_p8 = scmp.eq.s32.totalorder %s150_s11, 0 }
  0x1c   : > { %s43_s13 = ssub.s32 %s2943_s5, %s42_s12  ;;  %p163_p9 = scmp.ne.s32.totalorder %s2816_s17, %s2812_s16 }
  0x1d   : > { %p44_p10 = scmp.eq.s32.totalorder %s43_s13, 0  ;;  %p164_p11 = scmp.eq.s32.totalorder %s2936_s26, 3 }
  0x1e   : > { %s2974_s14 = scalar_select %p151_p8, %s2816_s17, %s153_s9  }
  0x1f   : > { %s2977_s18 = scalar_select %p44_p10, %s2828_s20, %s46_s6  }
  0x20   : > { %4098 = sst [smem:[#allocation17_spill]] %s2974_s14  ;;  %p2979_p12 = por %p164_p11, %p163_p9 }
  0x21   : > { %4099 = sst [smem:[#allocation18_spill]] %s2977_s18  ;;  %p169_p13 = scmp.ne.s32.totalorder %s2812_s16, %s2808_s15 }
  0x22   : > { %p170_p0 = scmp.eq.s32.totalorder %s1975_s27, 3  ;;  %p2539_p1 = scmp.lt.s32.totalorder %s2848_s25, 4 }
  0x23   : > { %s4087_s10 = sand.u32 1, %s2828_s20   ;;  %s2998_s9 = sshll.u32 %s2943_s5, 7 }
  0x24   : > { %p2989_p2 = por %p170_p0, %p169_p13  ;;  %s2995_s12 = sshll.u32 %s4087_s10, 3 }
  0x25   : > { %p3002_p3 = pnand %p2539_p1, %p2953_p5  ;;  %s213_s27 = sand.u32 1, %s2848_s25  }
  0x26   : > { %s4103_s1 = sld [smem:[#allocation20_spill]]  ;;  %s217_s24 = scalar_lea.vmem [#allocation5], %s2995_s12 }
  0x27   : > { %s226_s23 = sshll.u32 %s217_s24, 4  ;;  %p1993_p4 = scmp.ge.s32.totalorder %s2848_s25, 1  ;;  %s227_s23 = int_to_ptr.vmem [resolvable:$true] %s226_s23 }
  0x28   : > { %s3013_s10 = scalar_lea.sflag [#allocation6], %s213_s27  ;;  %p2642_p6 = pneg %p3002_p3 }
  0x29   : > { %s2653_s5 = scalar_lea.vmem %s227_s23, 128  ;;  %s2850_s7 = smov [#allocation5]  }
  0x2a   : > { %p2654_p5 = scmp.ne.s32.totalorder %s227_s23, %s2653_s5  ;;  %s2658_s18 = sshll.u32 %s2850_s7, 4  ;;  %s2659_s18 = int_to_ptr.vmem [resolvable:$false] %s2658_s18 }
  0x2b   : > { %s2660_s14 = scalar_lea.vmem %s2659_s18, 256  ;;  %p2661_p10 = scmp.lt.s32.totalorder %s227_s23, %s2659_s18 }
  0x2c   : > { %s224_s28 = scalar_lea.hbm %s4103_s1, %s2998_s9  ;;  %p2656_p8 = pnand %p2654_p5, %p2642_p6 }
  0x2d   : > { %p2662_p11 = scmp.lt.s32.totalorder %s2660_s14, %s2653_s5 }
  0x2e   : > { %p2657_p9 = pneg %p2656_p8 }
  0x2f   : > { %p2663_p13 = por %p2662_p11, %p2661_p10 }
  0x31   : > { %p2664_p0 = pnand %p2663_p13, %p2657_p9 }
  0x33   : > { %2667 = shalt.err (!%p2664_p0)
}
  0x34   : > { %2531 = dma.hbm_to_vmem [thread:$0]  (!%p3002_p3), %s224_s28, 128, %s227_s23, %s3013_s10  }
  0x35   : > { %p251_p1 = scmp.lt.s32.totalorder %s2848_s25, 5  ;;  %s4105_s0 = sld [smem:[#allocation19_spill]] }
  0x36   : > { %s197_s27 = scalar_lea.vmem [#allocation2], %s2995_s12  ;;  %s4106_s5 = sand.u32 1, %s2828_s20  }
  0x37   : > { %p3026_p5 = pnand %p1993_p4, %p251_p1  ;;  %s206_s13 = sshll.u32 %s197_s27, 4  ;;  %s207_s13 = int_to_ptr.vmem [resolvable:$true] %s206_s13 }
  0x38   : > { %s194_s7 = scalar_lea.sflag [#allocation3], %s4106_s5  ;;  %s2681_s1 = scalar_lea.vmem %s207_s13, 128 }
  0x39   : > { %p2682_p8 = scmp.ne.s32.totalorder %s207_s13, %s2681_s1  ;;  %s2851_s23 = smov [#allocation2]  }
  0x3a   : > { %s2686_s28 = sshll.u32 %s2851_s23, 4  ;;  %s2687_s28 = int_to_ptr.vmem [resolvable:$false] %s2686_s28 }
  0x3b   : > { %s204_s18 = scalar_lea.hbm %s4105_s0, %s2998_s9  ;;  %p2684_p9 = pnand %p2682_p8, %p2642_p6 }
  0x3c   : > { %s2688_s17 = scalar_lea.vmem %s2687_s28, 256  ;;  %p2689_p4 = scmp.lt.s32.totalorder %s207_s13, %s2687_s28 }
  0x3d   : > { %p2685_p10 = pneg %p2684_p9  ;;  %p2690_p11 = scmp.lt.s32.totalorder %s2688_s17, %s2681_s1 }
  0x3f   : > { %p2691_p13 = por %p2690_p11, %p2689_p4 }
  0x41   : > { %p2692_p0 = pnand %p2691_p13, %p2685_p10 }
  0x43   : > { %2695 = shalt.err (!%p2692_p0)
}
  0x44   : > { %2528 = dma.hbm_to_vmem [thread:$0]  (!%p3002_p3), %s204_s18, 128, %s207_s13, %s194_s7  }
  0x45   : > { %s244_s27 = scalar_lea.hbm %s4080_s2, %s2998_s9  ;;  %s237_s5 = scalar_lea.vmem [#allocation7], %s2995_s12 }
  0x46   : > { %s246_s0 = sshll.u32 %s237_s5, 4  ;;  %s2852_s1 = smov [#allocation7]   ;;  %s247_s0 = int_to_ptr.vmem [resolvable:$true] %s246_s0 }
  0x47   : > { %s2709_s23 = scalar_lea.vmem %s247_s0, 128  ;;  %s2714_s17 = sshll.u32 %s2852_s1, 4  ;;  %s2715_s17 = int_to_ptr.vmem [resolvable:$false] %s2714_s17 }
  0x48   : > { %p2710_p1 = scmp.ne.s32.totalorder %s247_s0, %s2709_s23  ;;  %s2716_s28 = scalar_lea.vmem %s2715_s17, 256 }
  0x49   : > { %p2717_p10 = scmp.lt.s32.totalorder %s247_s0, %s2715_s17  ;;  %p2718_p4 = scmp.lt.s32.totalorder %s2716_s28, %s2709_s23 }
  0x4a   : > { %p2712_p8 = pnand %p2710_p1, %p2642_p6 }
  0x4b   : > { %p2719_p11 = por %p2718_p4, %p2717_p10 }
  0x4c   : > { %p2713_p9 = pneg %p2712_p8 }
  0x4e   : > { %p2720_p13 = pnand %p2719_p11, %p2713_p9 }
  0x50   : > { %2723 = shalt.err (!%p2720_p13)
}
  0x51   : > { %2534 = dma.hbm_to_vmem [thread:$0]  (!%p3002_p3), %s244_s27, 128, %s247_s0, %s3013_s10  }
  0x52   : > { %255 = sbr.rel (%p3026_p5) target bundleno = 844 (0x34c), region = 36  ;;  %s257_s12 = sand.u32 (!%p3026_p5), 1, %s2824_s19  }
  0x53   : > { %s3056_s9 = sshll.u32 (!%p3026_p5), %s257_s12, 3  ;;  %s258_s18 = scalar_lea.sflag (!%p3026_p5), [#allocation3], %s257_s12 }
  0x54   : > { %s261_s13 = scalar_lea.vmem (!%p3026_p5), [#allocation2], %s3056_s9 }
  0x57   : > { %2795 = dma.done.wait (%p2960_p7), %s258_s18, 128  }
  0x58   : > { %2797 = vsyncadd (%p2960_p7), %s258_s18, 4294967168  ;;  %s266_s0 = sand.u32 1, %s2936_s26   ;;  %s270_s6 = scalar_lea.vmem [#allocation5], %s3056_s9 }
  0x59   : > { %s267_s10 = scalar_lea.sflag [#allocation6], %s266_s0 }
  0x5a   : > { %2799 = dma.done.wait (%p2960_p7), %s267_s10, 256  }
  0x5b   : > { %2801 = vsyncadd (%p2960_p7), %s267_s10, 4294967040  ;;  %s311_s24 = sand.u32 1, %s2812_s16   ;;  %s279_s7 = scalar_lea.vmem [#allocation7], %s3056_s9 }
  0x5c   : > { %s3073_s29 = scalar_lea.vmem [#allocation8], %s311_s24  ;;  %p1997_p3 = scmp.ne.s32.totalorder %s2832_s21, 0 }
  0x5e   : > { %322 = sbr.rel (%p1997_p3) target bundleno = 101 (0x65), region = 52 }
  0x63   : > { %v2853_v0 = vmov 0.0  }
  0x64   : > { %323 = vst [vmem:[%s3073_s29] sm:$0x1] %v2853_v0 }
  0x65 PF: > { %v325_v1 = vlaneseq  ;;  %v3077_v2 = vld [vmem:[%s279_s7] sm:$0xff]  ;;  %v2854_v3 = vmov 0.0   ;;  %v2855_v13 = vmov 1.0   ;;  %v3188_v22 = vld [vmem:[%s270_s6] sm:$0xff]  ;;  %s2514_s8 = sshll.u32 %s2836_s22, 4  ;;  %s1848_s14 = sshll.u32 %s3073_s29, 4  ;;  %s1849_s14 = int_to_ptr.vmem [resolvable:$true] %s1848_s14 }
  0x66   : > { %580 = vmatprep.mubr.f32.mxu1 %v2854_v3  ;;  %v3083_v5 = vrot.slane %v3077_v2, 1  ;;  %v3204_v25 = vrot.slane %v3188_v22, 1  ;;  %v3272_v32 = vld [vmem:[%s4081_s3] sm:$0x1]  ;;  %s1846_s23 = scalar_lea.hbm %s4082_s4, %s2514_s8  ;;  %s1836_s1 = scalar_lea.sflag [#allocation4], %s311_s24 }
  0x67   : > { %v3080_v4 = vshrl.u32 %v325_v1, 7  ;;  %v3573_v37 = vld [vmem:[%s261_s13] sm:$0xff]  ;;  %s2724_s17 = scalar_lea.vmem %s1849_s14, 16  ;;  %s2856_s28 = smov [#allocation8]  }
  0x68   : > { %v3576_v38 = vrot.slane %v3573_v37, 1  ;;  %v358_v40 = vmul.f32 %v3573_v37, %v3573_v37  ;;  %v378_v44 = vmul.f32 0.25, %v3573_v37  ;;  %v366_v1 = vmul.f32 0.015625, %v3573_v37  ;;  %p2725_p7 = scmp.ne.s32.totalorder %s1849_s14, %s2724_s17  ;;  %s2728_s12 = sshll.u32 %s2856_s28, 4  ;;  %s2729_s12 = int_to_ptr.vmem [resolvable:$false] %s2728_s12 }
  0x69   : > { %v3086_v6 = vadd.s32 120, %v3080_v4  ;;  %v3089_v7 = vsub.s32 0, %v3080_v4  ;;  %v3092_v8 = vadd.s32 112, %v3080_v4  ;;  %v3103_v11 = vadd.s32 104, %v3080_v4  ;;  %s2730_s22 = scalar_lea.vmem %s2729_s12, 32  ;;  %p2731_p0 = scmp.lt.s32.totalorder %s1849_s14, %s2729_s12 }
  0x6a   : > { %v3112_v12 = vadd.s32 96, %v3080_v4  ;;  %v3121_v14 = vadd.s32 88, %v3080_v4  ;;  %v3130_v15 = vadd.s32 80, %v3080_v4  ;;  %v3139_v16 = vadd.s32 72, %v3080_v4  ;;  %p2726_p6 = pnand %p2725_p7, %p2979_p12  ;;  %p2732_p1 = scmp.lt.s32.totalorder %s2730_s22, %s2724_s17 }
  0x6b   : > { %v3096_v9 = vrot.slane %v3083_v5, %v3089_v7  ;;  %v3100_v10 = vrot.slane %v3077_v2, %v3089_v7  ;;  %v3148_v17 = vadd.s32 64, %v3080_v4  ;;  %v3157_v18 = vadd.s32 56, %v3080_v4 }
  0x6c   : > { %v3166_v19 = vadd.s32 48, %v3080_v4  ;;  %v3175_v20 = vadd.s32 40, %v3080_v4  ;;  %v3184_v21 = vadd.s32 32, %v3080_v4  ;;  %v3197_v23 = vadd.s32 24, %v3080_v4  ;;  %p2727_p5 = pneg %p2726_p6  ;;  %p2733_p8 = por %p2732_p1, %p2731_p0 }
  0x6d   : > { %vm451_vm0 = vcmp.eq.s32.totalorder %v3096_v9, %v3086_v6  ;;  %vm450_vm1 = vcmp.eq.s32.totalorder %v3100_v10, %v3086_v6  ;;  %vm449_vm2 = vcmp.eq.s32.totalorder %v3096_v9, %v3092_v8  ;;  %vm448_vm3 = vcmp.eq.s32.totalorder %v3100_v10, %v3092_v8 }
  0x6e   : > { %2034 = vmatprep.subr.msk.mxu1 %vm451_vm0, %v2855_v13  ;;  %vm447_vm4 = vcmp.eq.s32.totalorder %v3096_v9, %v3103_v11  ;;  %vm446_vm5 = vcmp.eq.s32.totalorder %v3100_v10, %v3103_v11  ;;  %vm445_vm6 = vcmp.eq.s32.totalorder %v3096_v9, %v3112_v12  ;;  %vm444_vm7 = vcmp.eq.s32.totalorder %v3100_v10, %v3112_v12  ;;  %p2734_p9 = pnand %p2733_p8, %p2727_p5 }
  0x6f   : > { %2035 = vmatpush1.msk.msra.mxu1 %vm450_vm1, %v2855_v13  ;;  %vm443_vm8 = vcmp.eq.s32.totalorder %v3096_v9, %v3121_v14  ;;  %vm442_vm9 = vcmp.eq.s32.totalorder %v3100_v10, %v3121_v14  ;;  %vm441_vm10 = vcmp.eq.s32.totalorder %v3096_v9, %v3130_v15  ;;  %vm440_vm11 = vcmp.eq.s32.totalorder %v3100_v10, %v3130_v15 }
  0x70   : > { %2036 = vmatprep.subr.msk.mxu1 %vm449_vm2, %v2855_v13  ;;  %vm439_vm12 = vcmp.eq.s32.totalorder %v3096_v9, %v3139_v16  ;;  %vm438_vm13 = vcmp.eq.s32.totalorder %v3100_v10, %v3139_v16  ;;  %vm437_vm14 = vcmp.eq.s32.totalorder %v3096_v9, %v3148_v17  ;;  %vm436_vm15 = vcmp.eq.s32.totalorder %v3100_v10, %v3148_v17 }
  0x71   : > { %2037 = vmatpush1.msk.msra.mxu1 %vm448_vm3, %v2855_v13  ;;  %vm435_vm0 = vcmp.eq.s32.totalorder %v3096_v9, %v3157_v18  ;;  %vm434_vm1 = vcmp.eq.s32.totalorder %v3100_v10, %v3157_v18  ;;  %vm433_vm2 = vcmp.eq.s32.totalorder %v3096_v9, %v3166_v19  ;;  %vm432_vm3 = vcmp.eq.s32.totalorder %v3100_v10, %v3166_v19 }
  0x72   : > { %2038 = vmatprep.subr.msk.mxu1 %vm447_vm4, %v2855_v13  ;;  %vm431_vm4 = vcmp.eq.s32.totalorder %v3096_v9, %v3175_v20  ;;  %v695_v24 = vsub.s32 2, %v3080_v4  ;;  %v3210_v26 = vadd.s32 16, %v3080_v4  ;;  %v3222_v28 = vadd.s32 8, %v3080_v4 }
  0x73   : > { %2039 = vmatpush1.msk.msra.mxu1 %vm446_vm5, %v2855_v13  ;;  %vm430_vm5 = vcmp.eq.s32.totalorder %v3100_v10, %v3175_v20  ;;  %v3392_v33 = vrot.slane %v3204_v25, %v3089_v7  ;;  %v3399_v34 = vrot.slane %v3188_v22, %v3089_v7  ;;  %v3558_v35 = vsub.s32 4, %v3080_v4 }
  0x74   : > { %2040 = vmatprep.subr.msk.mxu1 %vm445_vm6, %v2855_v13  ;;  %vm429_vm6 = vcmp.eq.s32.totalorder %v3096_v9, %v3184_v21  ;;  %v3216_v27 = vrot.slane %v3204_v25, %v695_v24  ;;  %v3225_v29 = vrot.slane %v3188_v22, %v695_v24  ;;  %v3248_v30 = vrot.slane %v3083_v5, %v695_v24 }
  0x75   : > { %2041 = vmatpush1.msk.msra.mxu1 %vm444_vm7, %v2855_v13  ;;  %vm428_vm7 = vcmp.eq.s32.totalorder %v3100_v10, %v3184_v21  ;;  %v3257_v31 = vrot.slane %v3077_v2, %v695_v24  ;;  %v3566_v36 = vrot.slane %v3083_v5, %v3558_v35  ;;  %v359_v39 = vmul.f32 %v3576_v38, %v3576_v38 }
  0x76   : > { %2042 = vmatprep.subr.msk.mxu1 %vm443_vm8, %v2855_v13  ;;  %vm427_vm8 = vcmp.eq.s32.totalorder %v3096_v9, %v3197_v23  ;;  %2632 = vrcp.f32 %v3576_v38  ;;  %v360_v42 = vadd.f32 1.0, %v358_v40  ;;  %v379_v43 = vmul.f32 0.25, %v3576_v38 }
  0x77   : > { %2043 = vmatpush1.msk.msra.mxu1 %vm442_vm9, %v2855_v13  ;;  %vm426_vm9 = vcmp.eq.s32.totalorder %v3100_v10, %v3197_v23  ;;  %v361_v41 = vadd.f32 1.0, %v359_v39  ;;  %2634 = vrcp.f32 %v3573_v37  ;;  %v384_v48 = vmul.f32 6.0, %v378_v44 }
  0x78   : > { %2044 = vmatprep.subr.msk.mxu1 %vm441_vm10, %v2855_v13  ;;  %vm915_vm10 = vcmp.eq.s32.totalorder %v3216_v27, %v3086_v6  ;;  %v385_v46 = vmul.f32 6.0, %v379_v43  ;;  %v389_v53 = vmul.f32 15.0, %v379_v43  ;;  %v388_v56 = vmul.f32 15.0, %v378_v44 }
  0x79   : > { %2045 = vmatpush1.msk.msra.mxu1 %vm440_vm11, %v2855_v13  ;;  %vm913_vm11 = vcmp.eq.s32.totalorder %v3216_v27, %v3092_v8  ;;  %2194 = vmatprep.subr.msk.mxu0 %vm915_vm10, %v2855_v13  ;;  %vm909_vm10 = vcmp.eq.s32.totalorder %v3216_v27, %v3112_v12  ;;  %2636 = vrsqrt.f32 %v361_v41  ;;  %v386_v55 = vmul.f32 %v384_v48, %v378_v44 }
  0x7a   : > { %2046 = vmatprep.subr.msk.mxu1 %vm439_vm12, %v2855_v13  ;;  %vm425_vm12 = vcmp.eq.s32.totalorder %v3096_v9, %v3210_v26  ;;  %2638 = vrsqrt.f32 %v360_v42  ;;  %v387_v52 = vmul.f32 %v385_v46, %v379_v43  ;;  %v381_v61 = vmul.f32 %v379_v43, %v379_v43 }
  0x7b   : > { %2047 = vmatpush1.msk.msra.mxu1 %vm438_vm13, %v2855_v13  ;;  %vm914_vm13 = vcmp.eq.s32.totalorder %v3225_v29, %v3086_v6  ;;  %v380_v63 = vmul.f32 %v378_v44, %v378_v44  ;;  %v390_v0 = vsub.f32 %v386_v55, %v388_v56 }
  0x7c   : > { %2048 = vmatprep.subr.msk.mxu1 %vm437_vm14, %v2855_v13  ;;  %vm424_vm14 = vcmp.eq.s32.totalorder %v3100_v10, %v3210_v26  ;;  %2195 = vmatpush1.xpose.msk.msra.mxu0 %vm914_vm13, %v2855_v13  ;;  %vm726_vm13 = vcmp.eq.s32.totalorder %v3248_v30, %v3112_v12  ;;  %v391_v62 = vsub.f32 %v387_v52, %v389_v53 }
  0x7d   : > { %2049 = vmatpush1.msk.msra.mxu1 %vm436_vm15, %v2855_v13  ;;  %vm423_vm15 = vcmp.eq.s32.totalorder %v3096_v9, %v3222_v28  ;;  %2196 = vmatprep.subr.msk.mxu0 %vm913_vm11, %v2855_v13  ;;  %vm728_vm11 = vcmp.eq.s32.totalorder %v3248_v30, %v3103_v11 }
  0x7e   : > { %2050 = vmatprep.subr.msk.mxu1 %vm435_vm0, %v2855_v13  ;;  %vm912_vm0 = vcmp.eq.s32.totalorder %v3225_v29, %v3092_v8 }
  0x7f   : > { %2051 = vmatpush1.msk.msra.mxu1 %vm434_vm1, %v2855_v13  ;;  %vm422_vm1 = vcmp.eq.s32.totalorder %v3100_v10, %v3222_v28 }
  0x80   : > { %2052 = vmatprep.subr.msk.mxu1 %vm433_vm2, %v2855_v13  ;;  %vm911_vm2 = vcmp.eq.s32.totalorder %v3216_v27, %v3103_v11  ;;  %2197 = vmatpush1.xpose.msk.msra.mxu0 %vm912_vm0, %v2855_v13  ;;  %vm907_vm0 = vcmp.eq.s32.totalorder %v3216_v27, %v3121_v14 }
  0x81   : > { %2053 = vmatpush1.msk.msra.mxu1 %vm432_vm3, %v2855_v13  ;;  %vm421_vm3 = vcmp.eq.s32.totalorder %v3096_v9, %v3080_v4  ;;  %2198 = vmatprep.subr.msk.mxu0 %vm911_vm2, %v2855_v13  ;;  %vm723_vm2 = vcmp.eq.s32.totalorder %v3257_v31, %v3121_v14  ;;  %v367_v9 = vmul.f32 0.015625, %v3576_v38 }
  0x82   : > { %2054 = vmatprep.subr.msk.mxu1 %vm431_vm4, %v2855_v13  ;;  %vm420_vm4 = vcmp.eq.s32.totalorder %v3100_v10, %v3080_v4 }
  0x83   : > { %2055 = vmatpush1.msk.msra.mxu1 %vm430_vm5, %v2855_v13  ;;  %vm732_vm5 = vcmp.eq.s32.totalorder %v3248_v30, %v3086_v6  ;;  %v2633_v45 = vpop.eup %2632 }
  0x84   : > { %2056 = vmatprep.subr.msk.mxu1 %vm429_vm6, %v2855_v13  ;;  %vm731_vm6 = vcmp.eq.s32.totalorder %v3257_v31, %v3086_v6  ;;  %v2635_v47 = vpop.eup %2634  ;;  %v353_v49 = vmul.f32 %v2633_v45, %v3576_v38 }
  0x85   : > { %2057 = vmatpush1.msk.msra.mxu1 %vm428_vm7, %v2855_v13  ;;  %vm730_vm7 = vcmp.eq.s32.totalorder %v3248_v30, %v3092_v8  ;;  %v352_v51 = vmul.f32 %v2635_v47, %v3573_v37 }
  0x86   : > { %2058 = vmatprep.subr.msk.mxu1 %vm427_vm8, %v2855_v13  ;;  %vm910_vm8 = vcmp.eq.s32.totalorder %v3225_v29, %v3103_v11  ;;  %v2637_v50 = vpop.eup %2636  ;;  %v355_v57 = vsub.f32 2.0, %v353_v49 }
  0x87   : > { %2059 = vmatpush1.msk.msra.mxu1 %vm426_vm9, %v2855_v13  ;;  %vm729_vm9 = vcmp.eq.s32.totalorder %v3257_v31, %v3092_v8  ;;  %2199 = vmatpush1.xpose.msk.msra.mxu0 %vm910_vm8, %v2855_v13  ;;  %vm719_vm8 = vcmp.eq.s32.totalorder %v3257_v31, %v3139_v16  ;;  %v2639_v54 = vpop.eup %2638  ;;  %v365_v58 = vmul.f32 %v2637_v50, %v361_v41  ;;  %v354_v59 = vsub.f32 2.0, %v352_v51 }
  0x88   : > { %2060 = vmatprep.subr.msk.mxu1 %vm425_vm12, %v2855_v13  ;;  %vm727_vm12 = vcmp.eq.s32.totalorder %v3257_v31, %v3103_v11  ;;  %2200 = vmatprep.subr.msk.mxu0 %vm909_vm10, %v2855_v13  ;;  %vm904_vm10 = vcmp.eq.s32.totalorder %v3225_v29, %v3130_v15  ;;  %v364_v60 = vmul.f32 %v2639_v54, %v360_v42 }
  0x89   : > { %2061 = vmatpush1.msk.msra.mxu1 %vm424_vm14, %v2855_v13  ;;  %vm908_vm14 = vcmp.eq.s32.totalorder %v3225_v29, %v3112_v12  ;;  %v357_v7 = vmul.f32 %v2633_v45, %v355_v57  ;;  %v373_v10 = vmul.f32 0.015625, %v365_v58  ;;  %v356_v24 = vmul.f32 %v2635_v47, %v354_v59 }
  0x8a   : > { %2062 = vmatprep.subr.msk.mxu1 %vm423_vm15, %v2855_v13  ;;  %vm725_vm15 = vcmp.eq.s32.totalorder %v3257_v31, %v3112_v12 }
  0x8b   : > { %2063 = vmatpush1.msk.msra.mxu1 %vm422_vm1, %v2855_v13  ;;  %vm724_vm1 = vcmp.eq.s32.totalorder %v3248_v30, %v3121_v14  ;;  %2201 = vmatpush1.xpose.msk.msra.mxu0 %vm908_vm14, %v2855_v13  ;;  %vm715_vm14 = vcmp.eq.s32.totalorder %v3257_v31, %v3157_v18  ;;  %v375_v39 = vadd.f32 %v2637_v50, %v373_v10 }
  0x8c   : > { %2064 = vmatprep.subr.msk.mxu1 %vm421_vm3, %v2855_v13  ;;  %vm722_vm3 = vcmp.eq.s32.totalorder %v3248_v30, %v3130_v15  ;;  %2202 = vmatprep.subr.msk.mxu0 %vm907_vm0, %v2855_v13  ;;  %vm902_vm0 = vcmp.eq.s32.totalorder %v3225_v29, %v3139_v16  ;;  %v368_v40 = vadd.f32 %v366_v1, %v356_v24  ;;  %v3675_v24 = vsub.s32 6, %v3080_v4 }
  0x8d   : > { %2065 = vmatpush1.msk.msra.mxu1 %vm420_vm4, %v2855_v13  ;;  %vm906_vm4 = vcmp.eq.s32.totalorder %v3225_v29, %v3121_v14  ;;  %v2001_v49 = vadd.f32 -0.25, %v375_v39 }
  0x8e   : > { %581 = vmatmul.mubr.f32.vlgmr.msra.gmra.mxu1 %v3272_v32  ;;  %2130 = vmatprep.subr.msk.mxu1 %vm732_vm5, %v2855_v13  ;;  %vm721_vm5 = vcmp.eq.s32.totalorder %v3257_v31, %v3130_v15  ;;  %v1998_v51 = vadd.f32 -0.25, %v368_v40 }
  0x8f   : > { %2131 = vmatpush1.msk.msra.mxu1 %vm731_vm6, %v2855_v13  ;;  %861 = vmatprep.mubr.f32.mxu1 %v2854_v3  ;;  %vm905_vm6 = vcmp.eq.s32.totalorder %v3216_v27, %v3130_v15 }
  0x90   : > { %2132 = vmatprep.subr.msk.mxu1 %vm730_vm7, %v2855_v13  ;;  %vm720_vm7 = vcmp.eq.s32.totalorder %v3248_v30, %v3139_v16  ;;  %2203 = vmatpush1.xpose.msk.msra.mxu0 %vm906_vm4, %v2855_v13  ;;  %vm710_vm4 = vcmp.eq.s32.totalorder %v3248_v30, %v3184_v21 }
  0x91   : > { %2133 = vmatpush1.msk.msra.mxu1 %vm729_vm9, %v2855_v13  ;;  %vm718_vm9 = vcmp.eq.s32.totalorder %v3248_v30, %v3148_v17  ;;  %2204 = vmatprep.subr.msk.mxu0 %vm905_vm6, %v2855_v13  ;;  %vm708_vm6 = vcmp.eq.s32.totalorder %v3248_v30, %v3197_v23 }
  0x92   : > { %2134 = vmatprep.subr.msk.mxu1 %vm728_vm11, %v2855_v13  ;;  %vm717_vm11 = vcmp.eq.s32.totalorder %v3257_v31, %v3148_v17 }
  0x93   : > { %2135 = vmatpush1.msk.msra.mxu1 %vm727_vm12, %v2855_v13  ;;  %vm903_vm12 = vcmp.eq.s32.totalorder %v3216_v27, %v3139_v16 }
  0x94   : > { %2136 = vmatprep.subr.msk.mxu1 %vm726_vm13, %v2855_v13  ;;  %vm716_vm13 = vcmp.eq.s32.totalorder %v3248_v30, %v3157_v18  ;;  %2205 = vmatpush1.xpose.msk.msra.mxu0 %vm904_vm10, %v2855_v13  ;;  %vm704_vm10 = vcmp.eq.s32.totalorder %v3248_v30, %v3222_v28 }
  0x95   : > { %2137 = vmatpush1.msk.msra.mxu1 %vm725_vm15, %v2855_v13  ;;  %vm714_vm15 = vcmp.eq.s32.totalorder %v3248_v30, %v3166_v19  ;;  %2206 = vmatprep.subr.msk.mxu0 %vm903_vm12, %v2855_v13  ;;  %vm702_vm12 = vcmp.eq.s32.totalorder %v3248_v30, %v3080_v4 }
  0x96   : > { %2138 = vmatprep.subr.msk.mxu1 %vm724_vm1, %v2855_v13  ;;  %vm713_vm1 = vcmp.eq.s32.totalorder %v3257_v31, %v3166_v19 }
  0x97   : > { %2139 = vmatpush1.msk.msra.mxu1 %vm723_vm2, %v2855_v13  ;;  %vm712_vm2 = vcmp.eq.s32.totalorder %v3248_v30, %v3175_v20 }
  0x98   : > { %2140 = vmatprep.subr.msk.mxu1 %vm722_vm3, %v2855_v13  ;;  %vm711_vm3 = vcmp.eq.s32.totalorder %v3257_v31, %v3175_v20  ;;  %2207 = vmatpush1.xpose.msk.msra.mxu0 %vm902_vm0, %v2855_v13  ;;  %vm626_vm0 = vcmp.eq.s32.totalorder %v3392_v33, %v3092_v8 }
  0x99   : > { %2141 = vmatpush1.msk.msra.mxu1 %vm721_vm5, %v2855_v13  ;;  %vm709_vm5 = vcmp.eq.s32.totalorder %v3257_v31, %v3184_v21 }
  0x9a   : > { %2142 = vmatprep.subr.msk.mxu1 %vm720_vm7, %v2855_v13  ;;  %vm707_vm7 = vcmp.eq.s32.totalorder %v3257_v31, %v3197_v23 }
  0x9b   : > { %2143 = vmatpush1.msk.msra.mxu1 %vm719_vm8, %v2855_v13  ;;  %vm706_vm8 = vcmp.eq.s32.totalorder %v3248_v30, %v3210_v26  ;;  %v393_v30 = vadd.f32 10.0, %v391_v62 }
  0x9c   : > { %2144 = vmatprep.subr.msk.mxu1 %vm718_vm9, %v2855_v13  ;;  %vm705_vm9 = vcmp.eq.s32.totalorder %v3257_v31, %v3210_v26 }
  0x9d   : > { %2145 = vmatpush1.msk.msra.mxu1 %vm717_vm11, %v2855_v13  ;;  %vm703_vm11 = vcmp.eq.s32.totalorder %v3257_v31, %v3222_v28 }
  0x9e   : > { %2146 = vmatprep.subr.msk.mxu1 %vm716_vm13, %v2855_v13  ;;  %vm701_vm13 = vcmp.eq.s32.totalorder %v3257_v31, %v3080_v4  ;;  %v382_v31 = vmul.f32 %v380_v63, %v378_v44 }
  0x9f   : > { %2147 = vmatpush1.msk.msra.mxu1 %vm715_vm14, %v2855_v13  ;;  %vm628_vm14 = vcmp.eq.s32.totalorder %v3392_v33, %v3086_v6 }
  0xa0   : > { %2148 = vmatprep.subr.msk.mxu1 %vm714_vm15, %v2855_v13  ;;  %vm627_vm15 = vcmp.eq.s32.totalorder %v3399_v34, %v3086_v6 }
  0xa1   : > { %2149 = vmatpush1.msk.msra.mxu1 %vm713_vm1, %v2855_v13  ;;  %vm625_vm1 = vcmp.eq.s32.totalorder %v3399_v34, %v3092_v8 }
  0xa2   : > { %2150 = vmatprep.subr.msk.mxu1 %vm712_vm2, %v2855_v13  ;;  %vm624_vm2 = vcmp.eq.s32.totalorder %v3392_v33, %v3103_v11 }
  0xa3   : > { %2151 = vmatpush1.msk.msra.mxu1 %vm711_vm3, %v2855_v13  ;;  %vm623_vm3 = vcmp.eq.s32.totalorder %v3399_v34, %v3103_v11 }
  0xa4   : > { %2152 = vmatprep.subr.msk.mxu1 %vm710_vm4, %v2855_v13  ;;  %vm622_vm4 = vcmp.eq.s32.totalorder %v3392_v33, %v3112_v12 }
  0xa5   : > { %2153 = vmatpush1.msk.msra.mxu1 %vm709_vm5, %v2855_v13  ;;  %vm621_vm5 = vcmp.eq.s32.totalorder %v3399_v34, %v3112_v12 }
  0xa6   : > { %2154 = vmatprep.subr.msk.mxu1 %vm708_vm6, %v2855_v13  ;;  %vm620_vm6 = vcmp.eq.s32.totalorder %v3392_v33, %v3121_v14 }
  0xa7   : > { %2155 = vmatpush1.msk.msra.mxu1 %vm707_vm7, %v2855_v13  ;;  %vm619_vm7 = vcmp.eq.s32.totalorder %v3399_v34, %v3121_v14 }
  0xa8   : > { %2156 = vmatprep.subr.msk.mxu1 %vm706_vm8, %v2855_v13  ;;  %vm618_vm8 = vcmp.eq.s32.totalorder %v3392_v33, %v3130_v15 }
  0xa9   : > { %2157 = vmatpush1.msk.msra.mxu1 %vm705_vm9, %v2855_v13  ;;  %vm617_vm9 = vcmp.eq.s32.totalorder %v3399_v34, %v3130_v15 }
  0xaa   : > { %2158 = vmatprep.subr.msk.mxu1 %vm704_vm10, %v2855_v13  ;;  %vm616_vm10 = vcmp.eq.s32.totalorder %v3392_v33, %v3139_v16 }
  0xab   : > { %2159 = vmatpush1.msk.msra.mxu1 %vm703_vm11, %v2855_v13  ;;  %vm615_vm11 = vcmp.eq.s32.totalorder %v3399_v34, %v3139_v16 }
  0xac   : > { %2160 = vmatprep.subr.msk.mxu1 %vm702_vm12, %v2855_v13  ;;  %vm614_vm12 = vcmp.eq.s32.totalorder %v3392_v33, %v3148_v17 }
  0xad   : > { %2161 = vmatpush1.msk.msra.mxu1 %vm701_vm13, %v2855_v13  ;;  %vm613_vm13 = vcmp.eq.s32.totalorder %v3399_v34, %v3148_v17 }
  0xae   : > { %862 = vmatmul.mubr.f32.vlgmr.msra.gmra.mxu1 %v3272_v32  ;;  %2226 = vmatprep.subr.msk.mxu1 %vm628_vm14, %v2855_v13  ;;  %vm612_vm14 = vcmp.eq.s32.totalorder %v3392_v33, %v3157_v18 }
  0xaf   : > { %2227 = vmatpush1.xpose.msk.msra.mxu1 %vm627_vm15, %v2855_v13  ;;  %vm611_vm15 = vcmp.eq.s32.totalorder %v3399_v34, %v3157_v18 }
  0xb0   : > { %2228 = vmatprep.subr.msk.mxu1 %vm626_vm0, %v2855_v13  ;;  %vm610_vm0 = vcmp.eq.s32.totalorder %v3392_v33, %v3166_v19 }
  0xb3   : > { %2229 = vmatpush1.xpose.msk.msra.mxu1 %vm625_vm1, %v2855_v13  ;;  %vm901_vm1 = vcmp.eq.s32.totalorder %v3216_v27, %v3148_v17 }
  0xb4   : > { %2230 = vmatprep.subr.msk.mxu1 %vm624_vm2, %v2855_v13  ;;  %2208 = vmatprep.subr.msk.mxu0 %vm901_vm1, %v2855_v13  ;;  %vm900_vm2 = vcmp.eq.s32.totalorder %v3225_v29, %v3148_v17  ;;  %vm602_vm1 = vcmp.eq.s32.totalorder %v3392_v33, %v3210_v26 }
  0xb5   : > { %2209 = vmatpush1.xpose.msk.msra.mxu0 %vm900_vm2, %v2855_v13  ;;  %vm892_vm2 = vcmp.eq.s32.totalorder %v3225_v29, %v3184_v21 }
  0xb7   : > { %2231 = vmatpush1.xpose.msk.msra.mxu1 %vm623_vm3, %v2855_v13  ;;  %vm609_vm3 = vcmp.eq.s32.totalorder %v3399_v34, %v3166_v19 }
  0xb8   : > { %2232 = vmatprep.subr.msk.mxu1 %vm622_vm4, %v2855_v13  ;;  %vm608_vm4 = vcmp.eq.s32.totalorder %v3392_v33, %v3175_v20 }
  0xbb   : > { %2233 = vmatpush1.xpose.msk.msra.mxu1 %vm621_vm5, %v2855_v13  ;;  %vm899_vm5 = vcmp.eq.s32.totalorder %v3216_v27, %v3157_v18 }
  0xbc   : > { %2234 = vmatprep.subr.msk.mxu1 %vm620_vm6, %v2855_v13  ;;  %2210 = vmatprep.subr.msk.mxu0 %vm899_vm5, %v2855_v13  ;;  %vm898_vm6 = vcmp.eq.s32.totalorder %v3225_v29, %v3157_v18  ;;  %vm600_vm5 = vcmp.eq.s32.totalorder %v3392_v33, %v3222_v28 }
  0xbd   : > { %2211 = vmatpush1.xpose.msk.msra.mxu0 %vm898_vm6, %v2855_v13  ;;  %vm890_vm6 = vcmp.eq.s32.totalorder %v3225_v29, %v3197_v23 }
  0xbf   : > { %2235 = vmatpush1.xpose.msk.msra.mxu1 %vm619_vm7, %v2855_v13  ;;  %vm607_vm7 = vcmp.eq.s32.totalorder %v3399_v34, %v3175_v20 }
  0xc0   : > { %2236 = vmatprep.subr.msk.mxu1 %vm618_vm8, %v2855_v13  ;;  %vm897_vm8 = vcmp.eq.s32.totalorder %v3216_v27, %v3166_v19 }
  0xc1   : > { %2212 = vmatprep.subr.msk.mxu0 %vm897_vm8, %v2855_v13  ;;  %vm599_vm8 = vcmp.eq.s32.totalorder %v3399_v34, %v3222_v28 }
  0xc3   : > { %2237 = vmatpush1.xpose.msk.msra.mxu1 %vm617_vm9, %v2855_v13  ;;  %vm606_vm9 = vcmp.eq.s32.totalorder %v3392_v33, %v3184_v21 }
  0xc4   : > { %2238 = vmatprep.subr.msk.mxu1 %vm616_vm10, %v2855_v13  ;;  %vm896_vm10 = vcmp.eq.s32.totalorder %v3225_v29, %v3166_v19 }
  0xc5   : > { %2213 = vmatpush1.xpose.msk.msra.mxu0 %vm896_vm10, %v2855_v13  ;;  %vm888_vm10 = vcmp.eq.s32.totalorder %v3225_v29, %v3210_v26 }
  0xc7   : > { %2239 = vmatpush1.xpose.msk.msra.mxu1 %vm615_vm11, %v2855_v13  ;;  %vm895_vm11 = vcmp.eq.s32.totalorder %v3216_v27, %v3175_v20 }
  0xc8   : > { %2240 = vmatprep.subr.msk.mxu1 %vm614_vm12, %v2855_v13  ;;  %vm605_vm12 = vcmp.eq.s32.totalorder %v3399_v34, %v3184_v21  ;;  %2214 = vmatprep.subr.msk.mxu0 %vm895_vm11, %v2855_v13  ;;  %vm887_vm11 = vcmp.eq.s32.totalorder %v3216_v27, %v3222_v28 }
  0xcb   : > { %2241 = vmatpush1.xpose.msk.msra.mxu1 %vm613_vm13, %v2855_v13  ;;  %vm604_vm13 = vcmp.eq.s32.totalorder %v3392_v33, %v3197_v23 }
  0xcc   : > { %2242 = vmatprep.subr.msk.mxu1 %vm612_vm14, %v2855_v13  ;;  %vm894_vm14 = vcmp.eq.s32.totalorder %v3225_v29, %v3175_v20 }
  0xcd   : > { %2215 = vmatpush1.xpose.msk.msra.mxu0 %vm894_vm14, %v2855_v13  ;;  %vm885_vm14 = vcmp.eq.s32.totalorder %v3216_v27, %v3080_v4 }
  0xcf   : > { %2243 = vmatpush1.xpose.msk.msra.mxu1 %vm611_vm15, %v2855_v13  ;;  %vm893_vm15 = vcmp.eq.s32.totalorder %v3216_v27, %v3184_v21 }
  0xd0   : > { %2244 = vmatprep.subr.msk.mxu1 %vm610_vm0, %v2855_v13  ;;  %vm603_vm0 = vcmp.eq.s32.totalorder %v3399_v34, %v3197_v23  ;;  %2216 = vmatprep.subr.msk.mxu0 %vm893_vm15, %v2855_v13  ;;  %vm884_vm15 = vcmp.eq.s32.totalorder %v3225_v29, %v3080_v4 }
  0xd1   : > { %2217 = vmatpush1.xpose.msk.msra.mxu0 %vm892_vm2, %v2855_v13  ;;  %vm398_vm2 = vcmp.lt.f32.partialorder %v378_v44, 1.0 }
  0xd3   : > { %2245 = vmatpush1.xpose.msk.msra.mxu1 %vm609_vm3, %v2855_v13  ;;  %vm891_vm3 = vcmp.eq.s32.totalorder %v3216_v27, %v3197_v23 }
  0xd4   : > { %2246 = vmatprep.subr.msk.mxu1 %vm608_vm4, %v2855_v13  ;;  %vm601_vm4 = vcmp.eq.s32.totalorder %v3399_v34, %v3210_v26  ;;  %2218 = vmatprep.subr.msk.mxu0 %vm891_vm3, %v2855_v13  ;;  %vm409_vm3 = vcmp.le.f32.partialorder %v3576_v38, 8.0 }
  0xd5   : > { %2219 = vmatpush1.xpose.msk.msra.mxu0 %vm890_vm6, %v2855_v13  ;;  %vm1157_vm6 = vcmp.eq.s32.totalorder %v3566_v36, %v3092_v8 }
  0xd7   : > { %2247 = vmatpush1.xpose.msk.msra.mxu1 %vm607_vm7, %v2855_v13  ;;  %vm889_vm7 = vcmp.eq.s32.totalorder %v3216_v27, %v3210_v26  ;;  %v372_v27 = vmul.f32 0.015625, %v364_v60 }
  0xd8   : > { %2248 = vmatprep.subr.msk.mxu1 %vm606_vm9, %v2855_v13  ;;  %vm598_vm9 = vcmp.eq.s32.totalorder %v3392_v33, %v3080_v4  ;;  %2220 = vmatprep.subr.msk.mxu0 %vm889_vm7, %v2855_v13  ;;  %v392_v33 = vadd.f32 10.0, %v390_v0 }
  0xd9   : > { %2221 = vmatpush1.xpose.msk.msra.mxu0 %vm888_vm10, %v2855_v13  ;;  %v374_v41 = vadd.f32 %v2639_v54, %v372_v27  ;;  %vm1153_vm10 = vcmp.eq.s32.totalorder %v3566_v36, %v3112_v12  ;;  %v3691_v27 = vrot.slane %v3083_v5, %v3675_v24  ;;  %v3732_v5 = vrot.slane %v3188_v22, %v3558_v35 }
  0xda   : > { %2222 = vmatprep.subr.msk.mxu0 %vm887_vm11, %v2855_v13  ;;  %v394_v46 = vmul.f32 %v392_v33, %v382_v31 }
  0xdb   : > { %2249 = vmatpush1.xpose.msk.msra.mxu1 %vm605_vm12, %v2855_v13  ;;  %vm597_vm12 = vcmp.eq.s32.totalorder %v3399_v34, %v3080_v4  ;;  %v369_v34 = vadd.f32 %v367_v9, %v357_v7  ;;  %v2000_v52 = vadd.f32 -0.25, %v374_v41 }
  0xdc   : > { %2250 = vmatprep.subr.msk.mxu1 %vm604_vm13, %v2855_v13  ;;  %vm886_vm13 = vcmp.eq.s32.totalorder %v3225_v29, %v3222_v28  ;;  %v383_v29 = vmul.f32 %v381_v61, %v379_v43  ;;  %v396_v53 = vsub.f32 1.0, %v394_v46 }
  0xdd   : > { %2223 = vmatpush1.xpose.msk.msra.mxu0 %vm886_vm13, %v2855_v13  ;;  %v1999_v48 = vadd.f32 -0.25, %v369_v34  ;;  %v402_v55 = vsub.f32 %v2000_v52, %v1998_v51 }
  0xde   : > { %2224 = vmatprep.subr.msk.mxu0 %vm885_vm14, %v2855_v13  ;;  %v395_v42 = vmul.f32 %v393_v30, %v383_v29  ;;  %v400_v57 = vsel %vm398_vm2, %v396_v53, 0.0  ;;  %vm1149_vm14 = vcmp.eq.s32.totalorder %v3566_v36, %v3130_v15  ;;  %vm1145_vm2 = vcmp.eq.s32.totalorder %v3566_v36, %v3148_v17  ;;  %v1832_v30 = vld [vmem:[%s3073_s29] sm:$0x1] }
  0xdf   : > { %2251 = vmatpush1.xpose.msk.msra.mxu1 %vm603_vm0, %v2855_v13  ;;  %vm1159_vm0 = vcmp.eq.s32.totalorder %v3566_v36, %v3086_v6  ;;  %v403_v47 = vsub.f32 %v2001_v49, %v1999_v48  ;;  %v404_v59 = vmul.f32 %v402_v55, %v400_v57  ;;  %v3698_v29 = vrot.slane %v3077_v2, %v3675_v24 }
  0xe0   : > { %2252 = vmatprep.subr.msk.mxu1 %vm602_vm1, %v2855_v13  ;;  %v397_v45 = vsub.f32 1.0, %v395_v42  ;;  %vm399_vm1 = vcmp.lt.f32.partialorder %v379_v43, 1.0 }
  0xe1   : > { %2225 = vmatpush1.xpose.msk.msra.mxu0 %vm884_vm15, %v2855_v13  ;;  %v406_v50 = vadd.f32 %v1998_v51, %v404_v59 }
  0xe2   : > { %2290 = vmatprep.subr.msk.mxu0 %vm1159_vm0, %v2855_v13  ;;  %v401_v56 = vsel %vm399_vm1, %v397_v45, 0.0  ;;  %vm1147_vm0 = vcmp.eq.s32.totalorder %v3566_v36, %v3139_v16 }
  0xe3   : > { %2253 = vmatpush1.xpose.msk.msra.mxu1 %vm601_vm4, %v2855_v13  ;;  %v405_v58 = vmul.f32 %v403_v47, %v401_v56  ;;  %vm408_vm4 = vcmp.le.f32.partialorder %v3573_v37, 8.0  ;;  %v3602_v37 = vrot.slane %v3077_v2, %v3558_v35  ;;  %v3728_v2 = vrot.slane %v3204_v25, %v3558_v35 }
  0xe4   : > { %2254 = vmatprep.subr.msk.mxu1 %vm600_vm5, %v2855_v13  ;;  %v3594_v62 = vsel %vm408_vm4, %v406_v50, 0.0  ;;  %vm1143_vm4 = vcmp.eq.s32.totalorder %v3566_v36, %v3157_v18 }
  0xe5   : > { %v407_v60 = vadd.f32 %v1999_v48, %v405_v58  ;;  %v870_v7 = vrot.slane %v3594_v62, 2  ;;  %vm1158_vm5 = vcmp.eq.s32.totalorder %v3602_v37, %v3086_v6  ;;  %vm1156_vm7 = vcmp.eq.s32.totalorder %v3602_v37, %v3092_v8 }
  0xe6   : > { %vm1152_vm11 = vcmp.eq.s32.totalorder %v3602_v37, %v3112_v12  ;;  %vm1150_vm13 = vcmp.eq.s32.totalorder %v3602_v37, %v3121_v14  ;;  %vm1148_vm15 = vcmp.eq.s32.totalorder %v3602_v37, %v3130_v15  ;;  %vm1146_vm1 = vcmp.eq.s32.totalorder %v3602_v37, %v3139_v16 }
  0xe7   : > { %2255 = vmatpush1.xpose.msk.msra.mxu1 %vm599_vm8, %v2855_v13  ;;  %v3592_v61 = vsel %vm409_vm3, %v407_v60, 0.0  ;;  %vm1155_vm8 = vcmp.eq.s32.totalorder %v3566_v36, %v3103_v11  ;;  %vm1144_vm3 = vcmp.eq.s32.totalorder %v3602_v37, %v3148_v17 }
  0xe8   : > { %2256 = vmatprep.subr.msk.mxu1 %vm598_vm9, %v2855_v13  ;;  %v871_v0 = vrot.slane %v3592_v61, 2  ;;  %vm1154_vm9 = vcmp.eq.s32.totalorder %v3602_v37, %v3103_v11 }
  0xeb   : > { %2257 = vmatpush1.xpose.msk.msra.mxu1 %vm597_vm12, %v2855_v13  ;;  %vm1151_vm12 = vcmp.eq.s32.totalorder %v3566_v36, %v3121_v14 }
 0x14e   : > { %v582_v54 = vpop.f32.mrf.mxu1 }
 0x14f   : > { %v587_v44 = vmul.f32 %v582_v54, %v3594_v62 }
 0x150   : > { %v584_v63 = vpop.f32.mrf.mxu1 }
 0x151   : > { %v588_v43 = vmul.f32 %v584_v63, %v3592_v61 }
 0x153   : > { %1114 = vmatprep.mubr.f32.mxu1 %v588_v43 }
 0x154   : > { %1115 = vmatmul.mubr.f32.vlgmr.msra.gmra.mxu1 %v587_v44 }
 0x16e   : > { %v863_v1 = vpop.f32.mrf.mxu1 }
 0x16f   : > { %v874_v10 = vmul.f32 %v870_v7, %v863_v1 }
 0x170   : > { %v865_v38 = vpop.f32.mrf.mxu1 }
 0x171   : > { %v875_v9 = vmul.f32 %v871_v0, %v865_v38 }
 0x173   : > { %1044 = vmatprep.mubr.f32.mxu0 %v875_v9 }
 0x174   : > { %1045 = vmatmul.mubr.f32.vlgmr.msra.gmra.mxu0 %v874_v10 }
 0x175   : > { %2291 = vmatpush1.msk.msra.mxu0 %vm1158_vm5, %v2855_v13  ;;  %1288 = vmatprep.mubr.f32.mxu0 %v2854_v3  ;;  %vm1142_vm5 = vcmp.eq.s32.totalorder %v3602_v37, %v3157_v18 }
 0x176   : > { %2292 = vmatprep.subr.msk.mxu0 %vm1157_vm6, %v2855_v13  ;;  %vm1141_vm6 = vcmp.eq.s32.totalorder %v3566_v36, %v3166_v19 }
 0x177   : > { %2293 = vmatpush1.msk.msra.mxu0 %vm1156_vm7, %v2855_v13  ;;  %vm1140_vm7 = vcmp.eq.s32.totalorder %v3602_v37, %v3166_v19 }
 0x178   : > { %2294 = vmatprep.subr.msk.mxu0 %vm1155_vm8, %v2855_v13  ;;  %vm1139_vm8 = vcmp.eq.s32.totalorder %v3566_v36, %v3175_v20 }
 0x179   : > { %2295 = vmatpush1.msk.msra.mxu0 %vm1154_vm9, %v2855_v13  ;;  %vm1138_vm9 = vcmp.eq.s32.totalorder %v3602_v37, %v3175_v20 }
 0x17a   : > { %2296 = vmatprep.subr.msk.mxu0 %vm1153_vm10, %v2855_v13  ;;  %vm1137_vm10 = vcmp.eq.s32.totalorder %v3566_v36, %v3184_v21 }
 0x17b   : > { %2297 = vmatpush1.msk.msra.mxu0 %vm1152_vm11, %v2855_v13  ;;  %vm1136_vm11 = vcmp.eq.s32.totalorder %v3602_v37, %v3184_v21 }
 0x17c   : > { %2298 = vmatprep.subr.msk.mxu0 %vm1151_vm12, %v2855_v13  ;;  %vm1135_vm12 = vcmp.eq.s32.totalorder %v3566_v36, %v3197_v23 }
 0x17d   : > { %2299 = vmatpush1.msk.msra.mxu0 %vm1150_vm13, %v2855_v13  ;;  %vm1134_vm13 = vcmp.eq.s32.totalorder %v3602_v37, %v3197_v23 }
 0x17e   : > { %2300 = vmatprep.subr.msk.mxu0 %vm1149_vm14, %v2855_v13  ;;  %vm1133_vm14 = vcmp.eq.s32.totalorder %v3566_v36, %v3210_v26 }
 0x17f   : > { %2301 = vmatpush1.msk.msra.mxu0 %vm1148_vm15, %v2855_v13  ;;  %vm1132_vm15 = vcmp.eq.s32.totalorder %v3602_v37, %v3210_v26 }
 0x180   : > { %2302 = vmatprep.subr.msk.mxu0 %vm1147_vm0, %v2855_v13  ;;  %vm1131_vm0 = vcmp.eq.s32.totalorder %v3566_v36, %v3222_v28 }
 0x181   : > { %2303 = vmatpush1.msk.msra.mxu0 %vm1146_vm1, %v2855_v13  ;;  %vm1130_vm1 = vcmp.eq.s32.totalorder %v3602_v37, %v3222_v28 }
 0x182   : > { %2304 = vmatprep.subr.msk.mxu0 %vm1145_vm2, %v2855_v13  ;;  %vm1129_vm2 = vcmp.eq.s32.totalorder %v3566_v36, %v3080_v4 }
 0x183   : > { %2305 = vmatpush1.msk.msra.mxu0 %vm1144_vm3, %v2855_v13  ;;  %vm1128_vm3 = vcmp.eq.s32.totalorder %v3602_v37, %v3080_v4 }
 0x184   : > { %2306 = vmatprep.subr.msk.mxu0 %vm1143_vm4, %v2855_v13  ;;  %vm1515_vm4 = vcmp.eq.s32.totalorder %v3691_v27, %v3086_v6 }
 0x185   : > { %2307 = vmatpush1.msk.msra.mxu0 %vm1142_vm5, %v2855_v13  ;;  %vm1514_vm5 = vcmp.eq.s32.totalorder %v3698_v29, %v3086_v6 }
 0x186   : > { %2308 = vmatprep.subr.msk.mxu0 %vm1141_vm6, %v2855_v13  ;;  %vm1513_vm6 = vcmp.eq.s32.totalorder %v3691_v27, %v3092_v8 }
 0x187   : > { %2309 = vmatpush1.msk.msra.mxu0 %vm1140_vm7, %v2855_v13  ;;  %vm1512_vm7 = vcmp.eq.s32.totalorder %v3698_v29, %v3092_v8 }
 0x188   : > { %2310 = vmatprep.subr.msk.mxu0 %vm1139_vm8, %v2855_v13  ;;  %vm1511_vm8 = vcmp.eq.s32.totalorder %v3691_v27, %v3103_v11 }
 0x189   : > { %2311 = vmatpush1.msk.msra.mxu0 %vm1138_vm9, %v2855_v13  ;;  %vm1510_vm9 = vcmp.eq.s32.totalorder %v3698_v29, %v3103_v11 }
 0x18a   : > { %2312 = vmatprep.subr.msk.mxu0 %vm1137_vm10, %v2855_v13  ;;  %vm1509_vm10 = vcmp.eq.s32.totalorder %v3691_v27, %v3112_v12 }
 0x18b   : > { %2313 = vmatpush1.msk.msra.mxu0 %vm1136_vm11, %v2855_v13  ;;  %vm1508_vm11 = vcmp.eq.s32.totalorder %v3698_v29, %v3112_v12 }
 0x18c   : > { %2314 = vmatprep.subr.msk.mxu0 %vm1135_vm12, %v2855_v13  ;;  %vm1340_vm12 = vcmp.eq.s32.totalorder %v3728_v2, %v3086_v6 }
 0x18d   : > { %2315 = vmatpush1.msk.msra.mxu0 %vm1134_vm13, %v2855_v13  ;;  %vm1339_vm13 = vcmp.eq.s32.totalorder %v3732_v5, %v3086_v6  ;;  %2354 = vmatprep.subr.msk.mxu1 %vm1340_vm12, %v2855_v13  ;;  %vm1498_vm12 = vcmp.eq.s32.totalorder %v3698_v29, %v3157_v18 }
 0x18e   : > { %2316 = vmatprep.subr.msk.mxu0 %vm1133_vm14, %v2855_v13  ;;  %vm1338_vm14 = vcmp.eq.s32.totalorder %v3728_v2, %v3092_v8  ;;  %2355 = vmatpush1.xpose.msk.msra.mxu1 %vm1339_vm13, %v2855_v13  ;;  %vm1497_vm13 = vcmp.eq.s32.totalorder %v3691_v27, %v3166_v19 }
 0x18f   : > { %2317 = vmatpush1.msk.msra.mxu0 %vm1132_vm15, %v2855_v13  ;;  %vm1507_vm15 = vcmp.eq.s32.totalorder %v3691_v27, %v3121_v14  ;;  %2356 = vmatprep.subr.msk.mxu1 %vm1338_vm14, %v2855_v13  ;;  %vm1333_vm14 = vcmp.eq.s32.totalorder %v3732_v5, %v3112_v12 }
 0x190   : > { %2318 = vmatprep.subr.msk.mxu0 %vm1131_vm0, %v2855_v13  ;;  %vm1506_vm0 = vcmp.eq.s32.totalorder %v3698_v29, %v3121_v14 }
 0x191   : > { %2319 = vmatpush1.msk.msra.mxu0 %vm1130_vm1, %v2855_v13  ;;  %vm1505_vm1 = vcmp.eq.s32.totalorder %v3691_v27, %v3130_v15 }
 0x192   : > { %2320 = vmatprep.subr.msk.mxu0 %vm1129_vm2, %v2855_v13  ;;  %vm1337_vm2 = vcmp.eq.s32.totalorder %v3732_v5, %v3092_v8 }
 0x193   : > { %2321 = vmatpush1.msk.msra.mxu0 %vm1128_vm3, %v2855_v13  ;;  %vm1504_vm3 = vcmp.eq.s32.totalorder %v3698_v29, %v3130_v15  ;;  %2357 = vmatpush1.xpose.msk.msra.mxu1 %vm1337_vm2, %v2855_v13  ;;  %vm1494_vm2 = vcmp.eq.s32.totalorder %v3698_v29, %v3175_v20 }
 0x194   : > { %1289 = vmatmul.mubr.f32.vlgmr.msra.gmra.mxu0 %v3272_v32  ;;  %2418 = vmatprep.subr.msk.mxu0 %vm1515_vm4, %v2855_v13  ;;  %vm1336_vm4 = vcmp.eq.s32.totalorder %v3728_v2, %v3103_v11 }
 0x195   : > { %2419 = vmatpush1.msk.msra.mxu0 %vm1514_vm5, %v2855_v13  ;;  %1644 = vmatprep.mubr.f32.mxu0 %v2854_v3  ;;  %vm1503_vm5 = vcmp.eq.s32.totalorder %v3691_v27, %v3139_v16  ;;  %v3867_v3 = vrot.slane %v3204_v25, %v3675_v24 }
 0x196   : > { %2420 = vmatprep.subr.msk.mxu0 %vm1513_vm6, %v2855_v13  ;;  %vm1502_vm6 = vcmp.eq.s32.totalorder %v3698_v29, %v3139_v16  ;;  %2358 = vmatprep.subr.msk.mxu1 %vm1336_vm4, %v2855_v13  ;;  %vm1331_vm4 = vcmp.eq.s32.totalorder %v3732_v5, %v3121_v14 }
 0x197   : > { %2421 = vmatpush1.msk.msra.mxu0 %vm1512_vm7, %v2855_v13  ;;  %vm1501_vm7 = vcmp.eq.s32.totalorder %v3691_v27, %v3148_v17 }
 0x198   : > { %2422 = vmatprep.subr.msk.mxu0 %vm1511_vm8, %v2855_v13  ;;  %vm1335_vm8 = vcmp.eq.s32.totalorder %v3732_v5, %v3103_v11 }
 0x199   : > { %2423 = vmatpush1.msk.msra.mxu0 %vm1510_vm9, %v2855_v13  ;;  %vm1500_vm9 = vcmp.eq.s32.totalorder %v3698_v29, %v3148_v17  ;;  %2359 = vmatpush1.xpose.msk.msra.mxu1 %vm1335_vm8, %v2855_v13  ;;  %vm1490_vm8 = vcmp.eq.s32.totalorder %v3698_v29, %v3197_v23 }
 0x19a   : > { %2424 = vmatprep.subr.msk.mxu0 %vm1509_vm10, %v2855_v13  ;;  %vm1334_vm10 = vcmp.eq.s32.totalorder %v3728_v2, %v3112_v12 }
 0x19b   : > { %2425 = vmatpush1.msk.msra.mxu0 %vm1508_vm11, %v2855_v13  ;;  %vm1499_vm11 = vcmp.eq.s32.totalorder %v3691_v27, %v3157_v18  ;;  %2360 = vmatprep.subr.msk.mxu1 %vm1334_vm10, %v2855_v13  ;;  %vm1329_vm10 = vcmp.eq.s32.totalorder %v3732_v5, %v3130_v15 }
 0x19c   : > { %2426 = vmatprep.subr.msk.mxu0 %vm1507_vm15, %v2855_v13  ;;  %vm1496_vm15 = vcmp.eq.s32.totalorder %v3698_v29, %v3166_v19 }
 0x19d   : > { %2427 = vmatpush1.msk.msra.mxu0 %vm1506_vm0, %v2855_v13  ;;  %vm1332_vm0 = vcmp.eq.s32.totalorder %v3728_v2, %v3121_v14  ;;  %2361 = vmatpush1.xpose.msk.msra.mxu1 %vm1333_vm14, %v2855_v13  ;;  %vm1486_vm14 = vcmp.eq.s32.totalorder %v3698_v29, %v3222_v28 }
 0x19e   : > { %2428 = vmatprep.subr.msk.mxu0 %vm1505_vm1, %v2855_v13  ;;  %vm1495_vm1 = vcmp.eq.s32.totalorder %v3691_v27, %v3175_v20  ;;  %2362 = vmatprep.subr.msk.mxu1 %vm1332_vm0, %v2855_v13  ;;  %vm1327_vm0 = vcmp.eq.s32.totalorder %v3732_v5, %v3139_v16 }
 0x19f   : > { %2429 = vmatpush1.msk.msra.mxu0 %vm1504_vm3, %v2855_v13  ;;  %vm1493_vm3 = vcmp.eq.s32.totalorder %v3691_v27, %v3184_v21 }
 0x1a0   : > { %2430 = vmatprep.subr.msk.mxu0 %vm1503_vm5, %v2855_v13  ;;  %vm1492_vm5 = vcmp.eq.s32.totalorder %v3698_v29, %v3184_v21 }
 0x1a1   : > { %2431 = vmatpush1.msk.msra.mxu0 %vm1502_vm6, %v2855_v13  ;;  %vm1330_vm6 = vcmp.eq.s32.totalorder %v3728_v2, %v3130_v15  ;;  %2363 = vmatpush1.xpose.msk.msra.mxu1 %vm1331_vm4, %v2855_v13  ;;  %vm1324_vm4 = vcmp.eq.s32.totalorder %v3728_v2, %v3157_v18 }
 0x1a2   : > { %2432 = vmatprep.subr.msk.mxu0 %vm1501_vm7, %v2855_v13  ;;  %vm1491_vm7 = vcmp.eq.s32.totalorder %v3691_v27, %v3197_v23  ;;  %2364 = vmatprep.subr.msk.mxu1 %vm1330_vm6, %v2855_v13  ;;  %vm1323_vm6 = vcmp.eq.s32.totalorder %v3732_v5, %v3157_v18 }
 0x1a3   : > { %2433 = vmatpush1.msk.msra.mxu0 %vm1500_vm9, %v2855_v13  ;;  %vm1489_vm9 = vcmp.eq.s32.totalorder %v3691_v27, %v3210_v26 }
 0x1a4   : > { %2434 = vmatprep.subr.msk.mxu0 %vm1499_vm11, %v2855_v13  ;;  %vm1488_vm11 = vcmp.eq.s32.totalorder %v3698_v29, %v3210_v26 }
 0x1a5   : > { %2435 = vmatpush1.msk.msra.mxu0 %vm1498_vm12, %v2855_v13  ;;  %vm1328_vm12 = vcmp.eq.s32.totalorder %v3728_v2, %v3139_v16  ;;  %2365 = vmatpush1.xpose.msk.msra.mxu1 %vm1329_vm10, %v2855_v13 }
 0x1a6   : > { %2436 = vmatprep.subr.msk.mxu0 %vm1497_vm13, %v2855_v13  ;;  %vm1487_vm13 = vcmp.eq.s32.totalorder %v3691_v27, %v3222_v28  ;;  %2366 = vmatprep.subr.msk.mxu1 %vm1328_vm12, %v2855_v13  ;;  %vm1692_vm12 = vcmp.eq.s32.totalorder %v3867_v3, %v3103_v11 }
 0x1a7   : > { %2437 = vmatpush1.msk.msra.mxu0 %vm1496_vm15, %v2855_v13  ;;  %vm1485_vm15 = vcmp.eq.s32.totalorder %v3691_v27, %v3080_v4 }
 0x1a8   : > { %2438 = vmatprep.subr.msk.mxu0 %vm1495_vm1, %v2855_v13  ;;  %vm1484_vm1 = vcmp.eq.s32.totalorder %v3698_v29, %v3080_v4 }
 0x1a9   : > { %2439 = vmatpush1.msk.msra.mxu0 %vm1494_vm2, %v2855_v13  ;;  %2367 = vmatpush1.xpose.msk.msra.mxu1 %vm1327_vm0, %v2855_v13  ;;  %vm1326_vm2 = vcmp.eq.s32.totalorder %v3728_v2, %v3148_v17  ;;  %vm1690_vm0 = vcmp.eq.s32.totalorder %v3867_v3, %v3112_v12 }
 0x1aa   : > { %2440 = vmatprep.subr.msk.mxu0 %vm1493_vm3, %v2855_v13  ;;  %2368 = vmatprep.subr.msk.mxu1 %vm1326_vm2, %v2855_v13  ;;  %vm1325_vm3 = vcmp.eq.s32.totalorder %v3732_v5, %v3148_v17 }
 0x1ab   : > { %2441 = vmatpush1.msk.msra.mxu0 %vm1492_vm5, %v2855_v13  ;;  %vm1696_vm5 = vcmp.eq.s32.totalorder %v3867_v3, %v3086_v6 }
 0x1ac   : > { %2442 = vmatprep.subr.msk.mxu0 %vm1491_vm7, %v2855_v13  ;;  %vm1694_vm7 = vcmp.eq.s32.totalorder %v3867_v3, %v3092_v8 }
 0x1ad   : > { %2443 = vmatpush1.msk.msra.mxu0 %vm1490_vm8, %v2855_v13  ;;  %2369 = vmatpush1.xpose.msk.msra.mxu1 %vm1325_vm3, %v2855_v13  ;;  %vm1317_vm3 = vcmp.eq.s32.totalorder %v3732_v5, %v3184_v21 }
 0x1ae   : > { %2444 = vmatprep.subr.msk.mxu0 %vm1489_vm9, %v2855_v13  ;;  %2370 = vmatprep.subr.msk.mxu1 %vm1324_vm4, %v2855_v13  ;;  %vm1322_vm9 = vcmp.eq.s32.totalorder %v3728_v2, %v3166_v19  ;;  %vm1688_vm4 = vcmp.eq.s32.totalorder %v3867_v3, %v3121_v14 }
 0x1af   : > { %2445 = vmatpush1.msk.msra.mxu0 %vm1488_vm11, %v2855_v13  ;;  %vm1321_vm11 = vcmp.eq.s32.totalorder %v3732_v5, %v3166_v19 }
 0x1b0   : > { %2446 = vmatprep.subr.msk.mxu0 %vm1487_vm13, %v2855_v13  ;;  %vm1320_vm13 = vcmp.eq.s32.totalorder %v3728_v2, %v3175_v20 }
 0x1b1   : > { %2447 = vmatpush1.msk.msra.mxu0 %vm1486_vm14, %v2855_v13  ;;  %2371 = vmatpush1.xpose.msk.msra.mxu1 %vm1323_vm6, %v2855_v13 }
 0x1b2   : > { %2448 = vmatprep.subr.msk.mxu0 %vm1485_vm15, %v2855_v13  ;;  %2372 = vmatprep.subr.msk.mxu1 %vm1322_vm9, %v2855_v13  ;;  %vm1319_vm15 = vcmp.eq.s32.totalorder %v3732_v5, %v3175_v20  ;;  %vm1314_vm9 = vcmp.eq.s32.totalorder %v3728_v2, %v3210_v26 }
 0x1b3   : > { %2449 = vmatpush1.msk.msra.mxu0 %vm1484_vm1, %v2855_v13  ;;  %vm1318_vm1 = vcmp.eq.s32.totalorder %v3728_v2, %v3184_v21 }
 0x1b4   : > { %1645 = vmatmul.mubr.f32.vlgmr.msra.gmra.mxu0 %v3272_v32  ;;  %v3872_v32 = vrot.slane %v3188_v22, %v3675_v24  ;;  %2482 = vmatprep.subr.msk.mxu0 %vm1696_vm5, %v2855_v13  ;;  %vm1316_vm5 = vcmp.eq.s32.totalorder %v3728_v2, %v3197_v23 }
 0x1b5   : > { %2373 = vmatpush1.xpose.msk.msra.mxu1 %vm1321_vm11, %v2855_v13  ;;  %vm1313_vm11 = vcmp.eq.s32.totalorder %v3732_v5, %v3210_v26 }
 0x1b6   : > { %vm1695_vm8 = vcmp.eq.s32.totalorder %v3872_v32, %v3086_v6  ;;  %vm1693_vm10 = vcmp.eq.s32.totalorder %v3872_v32, %v3092_v8  ;;  %vm1691_vm14 = vcmp.eq.s32.totalorder %v3872_v32, %v3103_v11  ;;  %2374 = vmatprep.subr.msk.mxu1 %vm1320_vm13, %v2855_v13  ;;  %vm1689_vm2 = vcmp.eq.s32.totalorder %v3872_v32, %v3112_v12 }
 0x1b7   : > { %2483 = vmatpush1.xpose.msk.msra.mxu0 %vm1695_vm8, %v2855_v13  ;;  %vm1687_vm6 = vcmp.eq.s32.totalorder %v3872_v32, %v3121_v14  ;;  %vm1686_vm8 = vcmp.eq.s32.totalorder %v3867_v3, %v3130_v15  ;;  %vm1312_vm13 = vcmp.eq.s32.totalorder %v3728_v2, %v3222_v28 }
 0x1b8   : > { %2484 = vmatprep.subr.msk.mxu0 %vm1694_vm7, %v2855_v13  ;;  %vm1315_vm7 = vcmp.eq.s32.totalorder %v3732_v5, %v3197_v23 }
 0x1b9   : > { %2375 = vmatpush1.xpose.msk.msra.mxu1 %vm1319_vm15, %v2855_v13  ;;  %vm1311_vm15 = vcmp.eq.s32.totalorder %v3732_v5, %v3222_v28 }
 0x1ba   : > { %2376 = vmatprep.subr.msk.mxu1 %vm1318_vm1, %v2855_v13  ;;  %vm1682_vm1 = vcmp.eq.s32.totalorder %v3867_v3, %v3148_v17 }
 0x1bb   : > { %2485 = vmatpush1.xpose.msk.msra.mxu0 %vm1693_vm10, %v2855_v13  ;;  %vm1685_vm10 = vcmp.eq.s32.totalorder %v3872_v32, %v3130_v15  ;;  %v1296_v15 = vrot.slane %v3592_v61, 4 }
 0x1bc   : > { %2486 = vmatprep.subr.msk.mxu0 %vm1692_vm12, %v2855_v13  ;;  %vm1684_vm12 = vcmp.eq.s32.totalorder %v3867_v3, %v3139_v16 }
 0x1bd   : > { %2377 = vmatpush1.xpose.msk.msra.mxu1 %vm1317_vm3, %v2855_v13  ;;  %vm1681_vm3 = vcmp.eq.s32.totalorder %v3872_v32, %v3148_v17  ;;  %v1295_v17 = vrot.slane %v3594_v62, 4 }
 0x1be   : > { %2378 = vmatprep.subr.msk.mxu1 %vm1316_vm5, %v2855_v13  ;;  %vm1679_vm5 = vcmp.eq.s32.totalorder %v3872_v32, %v3157_v18 }
 0x1bf   : > { %2487 = vmatpush1.xpose.msk.msra.mxu0 %vm1691_vm14, %v2855_v13  ;;  %vm1683_vm14 = vcmp.eq.s32.totalorder %v3872_v32, %v3139_v16 }
 0x1c0   : > { %2488 = vmatprep.subr.msk.mxu0 %vm1690_vm0, %v2855_v13  ;;  %vm1310_vm0 = vcmp.eq.s32.totalorder %v3728_v2, %v3080_v4 }
 0x1c1   : > { %2379 = vmatpush1.xpose.msk.msra.mxu1 %vm1315_vm7, %v2855_v13  ;;  %vm1677_vm7 = vcmp.eq.s32.totalorder %v3872_v32, %v3166_v19 }
 0x1c2   : > { %2380 = vmatprep.subr.msk.mxu1 %vm1314_vm9, %v2855_v13  ;;  %vm1675_vm9 = vcmp.eq.s32.totalorder %v3872_v32, %v3175_v20 }
 0x1c3   : > { %2489 = vmatpush1.xpose.msk.msra.mxu0 %vm1689_vm2, %v2855_v13  ;;  %vm1309_vm2 = vcmp.eq.s32.totalorder %v3732_v5, %v3080_v4 }
 0x1c4   : > { %2490 = vmatprep.subr.msk.mxu0 %vm1688_vm4, %v2855_v13  ;;  %vm1680_vm4 = vcmp.eq.s32.totalorder %v3867_v3, %v3157_v18 }
 0x1c5   : > { %2381 = vmatpush1.xpose.msk.msra.mxu1 %vm1313_vm11, %v2855_v13  ;;  %vm1673_vm11 = vcmp.eq.s32.totalorder %v3872_v32, %v3184_v21 }
 0x1c6   : > { %2382 = vmatprep.subr.msk.mxu1 %vm1312_vm13, %v2855_v13  ;;  %vm1671_vm13 = vcmp.eq.s32.totalorder %v3872_v32, %v3197_v23 }
 0x1c7   : > { %2491 = vmatpush1.xpose.msk.msra.mxu0 %vm1687_vm6, %v2855_v13  ;;  %vm1678_vm6 = vcmp.eq.s32.totalorder %v3867_v3, %v3166_v19 }
 0x1c8   : > { %2492 = vmatprep.subr.msk.mxu0 %vm1686_vm8, %v2855_v13  ;;  %vm1676_vm8 = vcmp.eq.s32.totalorder %v3867_v3, %v3175_v20 }
 0x1c9   : > { %2383 = vmatpush1.xpose.msk.msra.mxu1 %vm1311_vm15, %v2855_v13  ;;  %vm1669_vm15 = vcmp.eq.s32.totalorder %v3872_v32, %v3210_v26 }
 0x1ca   : > { %2384 = vmatprep.subr.msk.mxu1 %vm1310_vm0, %v2855_v13  ;;  %vm1668_vm0 = vcmp.eq.s32.totalorder %v3867_v3, %v3222_v28 }
 0x1cb   : > { %2493 = vmatpush1.xpose.msk.msra.mxu0 %vm1685_vm10, %v2855_v13  ;;  %vm1674_vm10 = vcmp.eq.s32.totalorder %v3867_v3, %v3184_v21  ;;  %v1651_v21 = vrot.slane %v3594_v62, 6 }
 0x1cc   : > { %2494 = vmatprep.subr.msk.mxu0 %vm1684_vm12, %v2855_v13  ;;  %vm1672_vm12 = vcmp.eq.s32.totalorder %v3867_v3, %v3197_v23 }
 0x1cd   : > { %2385 = vmatpush1.xpose.msk.msra.mxu1 %vm1309_vm2, %v2855_v13  ;;  %vm1666_vm2 = vcmp.eq.s32.totalorder %v3867_v3, %v3080_v4 }
 0x1cf   : > { %2495 = vmatpush1.xpose.msk.msra.mxu0 %vm1683_vm14, %v2855_v13  ;;  %vm1670_vm14 = vcmp.eq.s32.totalorder %v3867_v3, %v3210_v26 }
 0x1d0   : > { %2496 = vmatprep.subr.msk.mxu0 %vm1682_vm1, %v2855_v13  ;;  %vm1667_vm1 = vcmp.eq.s32.totalorder %v3872_v32, %v3222_v28 }
 0x1d3   : > { %2497 = vmatpush1.xpose.msk.msra.mxu0 %vm1681_vm3, %v2855_v13  ;;  %vm1665_vm3 = vcmp.eq.s32.totalorder %v3872_v32, %v3080_v4  ;;  %v1652_v4 = vrot.slane %v3592_v61, 6 }
 0x1d4   : > { %2498 = vmatprep.subr.msk.mxu0 %vm1680_vm4, %v2855_v13 }
 0x1d7   : > { %2499 = vmatpush1.xpose.msk.msra.mxu0 %vm1679_vm5, %v2855_v13 }
 0x1d8   : > { %2500 = vmatprep.subr.msk.mxu0 %vm1678_vm6, %v2855_v13 }
 0x1db   : > { %2501 = vmatpush1.xpose.msk.msra.mxu0 %vm1677_vm7, %v2855_v13 }
 0x1dc   : > { %2502 = vmatprep.subr.msk.mxu0 %vm1676_vm8, %v2855_v13 }
 0x1df   : > { %2503 = vmatpush1.xpose.msk.msra.mxu0 %vm1675_vm9, %v2855_v13 }
 0x1e0   : > { %2504 = vmatprep.subr.msk.mxu0 %vm1674_vm10, %v2855_v13 }
 0x1e3   : > { %2505 = vmatpush1.xpose.msk.msra.mxu0 %vm1673_vm11, %v2855_v13 }
 0x1e4   : > { %2506 = vmatprep.subr.msk.mxu0 %vm1672_vm12, %v2855_v13 }
 0x1e7   : > { %2507 = vmatpush1.xpose.msk.msra.mxu0 %vm1671_vm13, %v2855_v13 }
 0x1e8   : > { %2508 = vmatprep.subr.msk.mxu0 %vm1670_vm14, %v2855_v13 }
 0x1eb   : > { %2509 = vmatpush1.xpose.msk.msra.mxu0 %vm1669_vm15, %v2855_v13 }
 0x1ec   : > { %2510 = vmatprep.subr.msk.mxu0 %vm1668_vm0, %v2855_v13 }
 0x1ef   : > { %2511 = vmatpush1.xpose.msk.msra.mxu0 %vm1667_vm1, %v2855_v13 }
 0x1f0   : > { %2512 = vmatprep.subr.msk.mxu0 %vm1666_vm2, %v2855_v13 }
 0x1f3   : > { %2513 = vmatpush1.xpose.msk.msra.mxu0 %vm1665_vm3, %v2855_v13 }
 0x214   : > { %v1116_v6 = vpop.f32.mrf.mxu1 }
 0x216   : > { %v1118_v8 = vpop.f32.mrf.mxu1 }
 0x234   : > { %v1046_v11 = vpop.f32.mrf.mxu0 }
 0x235   : > { %v1117_v12 = vadd.f32 %v1116_v6, %v1046_v11 }
 0x236   : > { %v1048_v14 = vpop.f32.mrf.mxu0 }
 0x254   : > { %v1290_v16 = vpop.f32.mrf.mxu0 }
 0x255   : > { %v1299_v20 = vmul.f32 %v1295_v17, %v1290_v16 }
 0x256   : > { %v1292_v18 = vpop.f32.mrf.mxu0 }
 0x257   : > { %v1300_v19 = vmul.f32 %v1296_v15, %v1292_v18 }
 0x259   : > { %1469 = vmatprep.mubr.f32.mxu1 %v1300_v19 }
 0x25a   : > { %1470 = vmatmul.mubr.f32.vlgmr.msra.gmra.mxu1 %v1299_v20 }
 0x274   : > { %v1646_v13 = vpop.f32.mrf.mxu0 }
 0x275   : > { %v1655_v25 = vmul.f32 %v1651_v21, %v1646_v13 }
 0x276   : > { %v1648_v22 = vpop.f32.mrf.mxu0 }
 0x277   : > { %v1656_v23 = vmul.f32 %v1652_v4, %v1648_v22 }
 0x279   : > { %1825 = vmatprep.mubr.f32.mxu0 %v1656_v23 }
 0x27a   : > { %1826 = vmatmul.mubr.f32.vlgmr.msra.gmra.mxu0 %v1655_v25 }
 0x31a   : > { %v1471_v26 = vpop.f32.mrf.mxu1 }
 0x31b   : > { %v1475_v35 = vadd.f32 %v1471_v26, %v1117_v12 }
 0x31c   : > { %v1473_v28 = vpop.f32.mrf.mxu1 }
 0x33a   : > { %v1827_v36 = vpop.f32.mrf.mxu0 }
 0x33b   : > { %v1831_v31 = vadd.f32 %v1827_v36, %v1475_v35 }
 0x33c   : > { %v1829_v33 = vpop.f32.mrf.mxu0 }
 0x33d   : > { %v1833_v34 = vadd.f32 %v1832_v30, %v1831_v31 }
 0x33f   : > { %1834 = vst [vmem:[%s3073_s29] sm:$0x1] %v1833_v34 }
 0x340   : > { %2737 = shalt.err (!%p2734_p9)
}
 0x341   : > { %s2738_s9 = scalar_lea.hbm %s1846_s23, 16  ;;  %s2742_s0 = scalar_lea.hbm %s4082_s4, 32 }
 0x342   : > { %p2739_p10 = scmp.ne.s32.totalorder %s1846_s23, %s2738_s9  ;;  %p2743_p13 = scmp.lt.s32.totalorder %s1846_s23, %s4082_s4 }
 0x343   : > { %p2744_p3 = scmp.lt.s32.totalorder %s2742_s0, %s2738_s9 }
 0x344   : > { %p2740_p4 = pnand %p2739_p10, %p2979_p12 }
 0x345   : > { %p2745_p7 = por %p2744_p3, %p2743_p13 }
 0x346   : > { %p2741_p11 = pneg %p2740_p4 }
 0x348   : > { %p2746_p6 = pnand %p2745_p7, %p2741_p11 }
 0x34a   : > { %2749 = shalt.err (!%p2746_p6)
}
 0x34b   : > { %2523 = dma.vmem_to_hbm [thread:$0]  (%p2979_p12), %s1849_s14, 16, %s1846_s23, %s1836_s1  }
 0x34c PF: > { %p2540_p5 = scmp.ge.s32.totalorder %s2848_s25, 2  ;;  %s1860_s24 = sand.u32 1, %s2808_s15  }
 0x34d   : > { %s1861_s7 = scalar_lea.sflag [#allocation4], %s1860_s24 }
 0x34e   : > { %p2536_p0 = pnand %p2540_p5, %p2989_p2 }
 0x350   : > { %p2537_p1 = pneg %p2536_p0 }
 0x352   : > { %2803 = dma.done.wait (%p2537_p1), %s1861_s7, 16  }
 0x353   : > { %2805 = vsyncadd (%p2537_p1), %s1861_s7, 4294967280  ;;  %s23_s25 = sadd.s32 1, %s2848_s25   ;;  %s4107_s29 = sld [smem:[#allocation12_spill]] }
 0x354   : > { %p20_p8 = scmp.ge.s32.totalorder %s23_s25, 6   ;;  %s4108_s17 = sld [smem:[#allocation17_spill]] }
 0x355   : > { %s4109_s30 = sld [smem:[#allocation18_spill]]  ;;  %s4114_s15 = smov %s2812_s16 }
 0x356   : > { %s4110_s21 = sld [smem:[#allocation13_spill]]  ;;  %s4116_s18 = smov %s2824_s19 }
 0x357   : > { %s4111_s22 = sld [smem:[#allocation14_spill]]  ;;  %s4117_s19 = smov %s2828_s20 }
 0x358   : > { %s4112_s23 = sld [smem:[#allocation15_spill]]  ;;  %22 = sbr.rel (!%p20_p8) target bundleno = 14 (0xe), region = 109 }
 0x359   : > { %s4113_s24 = sld [smem:[#allocation16_spill]]  ;;  %s4115_s16 = smov %s4107_s29 }
 0x35b   : > { %s4118_s20 = smov %s4109_s30 }
 0x35d   :  { %1865 = vsyncpa [#allocation3], 1 }
 0x35e   :  { %1867 = vsyncpa [#allocation3 + $0x1], 1 }
 0x35f   :  { %1868 = vsyncpa [#allocation6], 1 }
 0x360   :  { %1870 = vsyncpa [#allocation6 + $0x1], 1 }
 0x361   :  { %1871 = vsyncpa [#allocation4], 1 }
 0x362   :  { %1873 = vsyncpa [#allocation4 + $0x1], 1 }

</bundles_post_ra>
